<compile_context>
chip_gen: v6e
topology: v6e:2x2x1
jax: 0.10.0
libtpu: 0.0.40
codegen_flags: <defaults>
</compile_context>

<pallas_src>
import jax
import jax.numpy as jnp
import numpy as np
from jax import lax
from jax.experimental import pallas as pl
from jax.experimental.pallas import tpu as pltpu


def _round_up(x, m):
    return (x + m - 1) // m * m


def _genevector_kernel(ii_ref, jj_ref, wi_ref, wj_ref, out_ref, gi_acc, gj_acc):
    # ii_ref, jj_ref : (TB, 1) int32 index blocks (sublane-major)
    # wi_ref, wj_ref : (TN, D) table blocks, streamed along the N axis
    # out_ref        : (1, TB) lane-dense output block (written on last N step)
    # gi_acc, gj_acc : (TB, D) f32 gather accumulators (VMEM scratch)
    n = pl.program_id(1)
    num_n = pl.num_programs(1)
    tn = wi_ref.shape[0]
    tb = gi_acc.shape[0]

    @pl.when(n == 0)
    def _init():
        gi_acc[...] = jnp.zeros_like(gi_acc)
        gj_acc[...] = jnp.zeros_like(gj_acc)

    # Global table-row ids covered by this N block: [n*TN, (n+1)*TN).
    rows = lax.broadcasted_iota(jnp.int32, (tb, tn), 1) + n * tn
    oh_i = (rows == ii_ref[...]).astype(wi_ref.dtype)      # (TB, TN) one-hot
    oh_j = (rows == jj_ref[...]).astype(wj_ref.dtype)

    # One-hot gather on the MXU; accumulate partial gathers across N tiles.
    gi_acc[...] += jnp.dot(oh_i, wi_ref[...], preferred_element_type=jnp.float32)
    gj_acc[...] += jnp.dot(oh_j, wj_ref[...], preferred_element_type=jnp.float32)

    @pl.when(n == num_n - 1)
    def _finalize():
        prod = gi_acc[...] * gj_acc[...]                    # VPU
        # Lane reduce (XLU) + sublane->lane relayout into the lane-dense row.
        # TODO(synk): if this relayout ever binds at very large TB, switch to
        # prod @ ones((D,1)) plus a single transpose (perf-review opt #9).
        out_ref[...] = jnp.sum(prod, axis=-1)[None, :].astype(out_ref.dtype)


def genevector_forward(i_indices, j_indices, wi_weight, wj_weight, *,
                       tile_b=1024, tile_n=1024):
    """i_indices, j_indices: (B,) int; wi_weight, wj_weight: (N, D) float."""
    B = int(i_indices.shape[0])
    N, D = wi_weight.shape
    dtype = wi_weight.dtype
    itemsize = jnp.dtype(dtype).itemsize

    # ---- tile selection, gated on actual chip VMEM (v7x has only 64 MiB) ----
    try:
        vmem_cap = int(pltpu.get_tpu_info().vmem_capacity_bytes)
    except Exception:
        vmem_cap = 64 * 1024 * 1024              # conservative fallback (v7x)
    budget = vmem_cap // 3                        # headroom for pipelining etc.

    tb = max(256, min(_round_up(tile_b, 256), _round_up(B, 256)))
    tn = min(_round_up(N, 256), max(256, _round_up(tile_n, 256)))

    def vmem_need(tb_, tn_):
        return (2 * 2 * tn_ * D * itemsize        # 2 table blocks, double-buffered
                + 2 * tb_ * tn_ * 4               # one-hot operands
                + 2 * tb_ * D * 4                 # gather accumulators
                + 2 * 2 * tb_ * 4                 # index blocks
                + 2 * tb_ * itemsize)             # output block

    while vmem_need(tb, tn) > budget and tn > 256:
        tn = max(256, tn // 2)
    while vmem_need(tb, tn) > budget and tb > 256:
        tb = max(256, tb // 2)

    num_b = pl.cdiv(B, tb)
    b_pad = num_b * tb
    num_n = pl.cdiv(N, tn)
    n_pad = num_n * tn

    # Raise scoped-VMEM limit above the default when the tiles need it, while
    # staying well inside physical VMEM (64 MiB v7x, 128 MiB v5e/v6e).
    vmem_limit = int(min(max(32 * 1024 * 1024, 2 * vmem_need(tb, tn)),
                         max(32 * 1024 * 1024, vmem_cap - 16 * 1024 * 1024)))

    # Pad batch (padded rows gather row 0; sliced away below) and pad tables
    # along N with zero rows so every table block is full-sized.
    ii = jnp.pad(jnp.asarray(i_indices, jnp.int32), (0, b_pad - B)).reshape(b_pad, 1)
    jj = jnp.pad(jnp.asarray(j_indices, jnp.int32), (0, b_pad - B)).reshape(b_pad, 1)
    wi = wi_weight if n_pad == N else jnp.pad(wi_weight, ((0, n_pad - N), (0, 0)))
    wj = wj_weight if n_pad == N else jnp.pad(wj_weight, ((0, n_pad - N), (0, 0)))

    cost = pl.CostEstimate(
        flops=4 * b_pad * n_pad * D + 2 * b_pad * D,
        transcendentals=0,
        bytes_accessed=(num_b * 2 * n_pad * D * itemsize
                        + 2 * b_pad * 4 + num_b * tb * itemsize),
    )

    out = pl.pallas_call(
        _genevector_kernel,
        out_shape=jax.ShapeDtypeStruct((num_b, tb), dtype),
        grid_spec=pltpu.PrefetchScalarGridSpec(
            num_scalar_prefetch=0,
            grid=(num_b, num_n),
            in_specs=[
                pl.BlockSpec((tb, 1), lambda b, n: (b, 0)),   # i indices
                pl.BlockSpec((tb, 1), lambda b, n: (b, 0)),   # j indices
                pl.BlockSpec((tn, D), lambda b, n: (n, 0)),   # Wi block
                pl.BlockSpec((tn, D), lambda b, n: (n, 0)),   # Wj block
            ],
            out_specs=pl.BlockSpec((1, tb), lambda b, n: (b, 0)),
            scratch_shapes=[
                pltpu.VMEM((tb, D), jnp.float32),
                pltpu.VMEM((tb, D), jnp.float32),
            ],
        ),
        compiler_params=pltpu.CompilerParams(
            dimension_semantics=("parallel", "arbitrary"),
            vmem_limit_bytes=vmem_limit),
        cost_estimate=cost,
    )(ii, jj, wi, wj)

    return out.reshape(-1)[:B]


if __name__ == "__main__":
    # --- primary small, deterministic problem consistent with the module ----
    num_embeddings = 32
    embedding_dim = 128
    batch = 8

    key = jax.random.PRNGKey(0)
    k_wi, k_wj, k_i, k_j, k2_wi, k2_wj, k2_i, k2_j = jax.random.split(key, 8)

    # nn.Embedding weights initialized uniform(-1, 1), as in __init__.
    wi_weight = jax.random.uniform(
        k_wi, (num_embeddings, embedding_dim), jnp.float32, -1.0, 1.0)
    wj_weight = jax.random.uniform(
        k_wj, (num_embeddings, embedding_dim), jnp.float32, -1.0, 1.0)
    i_indices = jax.random.randint(k_i, (batch,), 0, num_embeddings, jnp.int32)
    j_indices = jax.random.randint(k_j, (batch,), 0, num_embeddings, jnp.int32)

    out = genevector_forward(i_indices, j_indices, wi_weight, wj_weight)
    out = jax.block_until_ready(out)
    ref = jnp.sum(wi_weight[i_indices] * wj_weight[j_indices], axis=1)
    np.testing.assert_allclose(np.asarray(out), np.asarray(ref),
                               rtol=1e-5, atol=1e-4)

    # --- secondary check exercising multiple batch tiles and N tiles --------
    N2, D2, B2 = 600, 128, 300
    wi2 = jax.random.uniform(k2_wi, (N2, D2), jnp.float32, -1.0, 1.0)
    wj2 = jax.random.uniform(k2_wj, (N2, D2), jnp.float32, -1.0, 1.0)
    ii2 = jax.random.randint(k2_i, (B2,), 0, N2, jnp.int32)
    jj2 = jax.random.randint(k2_j, (B2,), 0, N2, jnp.int32)

    out2 = genevector_forward(ii2, jj2, wi2, wj2, tile_b=256, tile_n=256)
    out2 = jax.block_until_ready(out2)
    ref2 = jnp.sum(wi2[ii2] * wj2[jj2], axis=1)
    np.testing.assert_allclose(np.asarray(out2), np.asarray(ref2),
                               rtol=1e-5, atol=1e-4)

    print("KERNEL_OK")
</pallas_src>

<mosaic_0001>
module attributes {stable_mosaic.version = 11 : i64} {
  func.func @_genevector_kernel(%arg0: i32, %arg1: i32, %arg2: memref<256x1xi32, #tpu.memory_space<vmem>>, %arg3: memref<256x1xi32, #tpu.memory_space<vmem>>, %arg4: memref<256x128xf32, #tpu.memory_space<vmem>>, %arg5: memref<256x128xf32, #tpu.memory_space<vmem>>, %arg6: memref<1x256xf32, #tpu.memory_space<vmem>>, %arg7: memref<256x128xf32, #tpu.memory_space<vmem>>, %arg8: memref<256x128xf32, #tpu.memory_space<vmem>>) attributes {dimension_semantics = [#tpu.dimension_semantics<parallel>, #tpu.dimension_semantics<arbitrary>], iteration_bounds = array<i64: 1, 1>, scalar_prefetch = 0 : i64, scratch_operands = 2 : i64, tpu.core_type = #tpu.core_type<tc>, window_params = [{transform_indices = @transform_0, window_bounds = array<i64: 256, 1>}, {transform_indices = @transform_1, window_bounds = array<i64: 256, 1>}, {transform_indices = @transform_2, window_bounds = array<i64: 256, 128>}, {transform_indices = @transform_3, window_bounds = array<i64: 256, 128>}, {transform_indices = @transform_4, window_bounds = array<i64: 1, 256>}]} {
    %c0_i32 = arith.constant 0 : i32
    %0 = arith.cmpi eq, %arg1, %c0_i32 : i32
    %1 = arith.extui %0 : i1 to i32
    %c0_i32_0 = arith.constant 0 : i32
    %2 = arith.cmpi ne, %1, %c0_i32_0 : i32
    scf.if %2 {
      %cst_19 = arith.constant 0.000000e+00 : f32
      %30 = vector.broadcast %cst_19 : f32 to vector<256x128xf32>
      %c0_20 = arith.constant 0 : index
      %c0_21 = arith.constant 0 : index
      %31 = vector.load %arg7[%c0_20, %c0_21] : memref<256x128xf32, #tpu.memory_space<vmem>>, vector<256x128xf32>
      tpu.vector_store %arg7[%c0_20, %c0_21], %30 {strides = array<i32>} : memref<256x128xf32, #tpu.memory_space<vmem>>, vector<256x128xf32>,
      %cst_22 = arith.constant 0.000000e+00 : f32
      %32 = vector.broadcast %cst_22 : f32 to vector<256x128xf32>
      %c0_23 = arith.constant 0 : index
      %c0_24 = arith.constant 0 : index
      %33 = vector.load %arg8[%c0_23, %c0_24] : memref<256x128xf32, #tpu.memory_space<vmem>>, vector<256x128xf32>
      tpu.vector_store %arg8[%c0_23, %c0_24], %32 {strides = array<i32>} : memref<256x128xf32, #tpu.memory_space<vmem>>, vector<256x128xf32>,
    } else {
    }
    %3 = tpu.iota {dimensions = array<i32: 1>} : vector<256x256xi32>
    %c256_i32 = arith.constant 256 : i32
    %4 = arith.muli %arg1, %c256_i32 : i32
    %5 = vector.broadcast %4 : i32 to vector<256x256xi32>
    %6 = arith.addi %3, %5 : vector<256x256xi32>
    %c0 = arith.constant 0 : index
    %c0_1 = arith.constant 0 : index
    %7 = vector.load %arg2[%c0, %c0_1] : memref<256x1xi32, #tpu.memory_space<vmem>>, vector<256x1xi32>
    %8 = vector.broadcast %7 : vector<256x1xi32> to vector<256x256xi32>
    %9 = arith.cmpi eq, %6, %8 : vector<256x256xi32>
    %10 = arith.extui %9 : vector<256x256xi1> to vector<256x256xi32>
    %11 = arith.sitofp %10 : vector<256x256xi32> to vector<256x256xf32>
    %c0_2 = arith.constant 0 : index
    %c0_3 = arith.constant 0 : index
    %12 = vector.load %arg3[%c0_2, %c0_3] : memref<256x1xi32, #tpu.memory_space<vmem>>, vector<256x1xi32>
    %13 = vector.broadcast %12 : vector<256x1xi32> to vector<256x256xi32>
    %14 = arith.cmpi eq, %6, %13 : vector<256x256xi32>
    %15 = arith.extui %14 : vector<256x256xi1> to vector<256x256xi32>
    %16 = arith.sitofp %15 : vector<256x256xi32> to vector<256x256xf32>
    %c0_4 = arith.constant 0 : index
    %c0_5 = arith.constant 0 : index
    %17 = vector.load %arg7[%c0_4, %c0_5] : memref<256x128xf32, #tpu.memory_space<vmem>>, vector<256x128xf32>
    %c0_6 = arith.constant 0 : index
    %c0_7 = arith.constant 0 : index
    %18 = vector.load %arg4[%c0_6, %c0_7] : memref<256x128xf32, #tpu.memory_space<vmem>>, vector<256x128xf32>
    %cst = arith.constant dense<0.000000e+00> : vector<256x128xf32>
    %19 = tpu.matmul %11, %18, %cst {dimension_numbers = #tpu.dot_dimension_numbers<[1], [0], [0], [1], [0, 0, 1, 1], [], []>} : vector<256x256xf32>, vector<256x128xf32>, vector<256x128xf32> -> vector<256x128xf32>
    %20 = arith.addf %17, %19 : vector<256x128xf32>
    %c0_8 = arith.constant 0 : index
    %c0_9 = arith.constant 0 : index
    %21 = vector.load %arg7[%c0_8, %c0_9] : memref<256x128xf32, #tpu.memory_space<vmem>>, vector<256x128xf32>
    tpu.vector_store %arg7[%c0_8, %c0_9], %20 {strides = array<i32>} : memref<256x128xf32, #tpu.memory_space<vmem>>, vector<256x128xf32>,
    %c0_10 = arith.constant 0 : index
    %c0_11 = arith.constant 0 : index
    %22 = vector.load %arg8[%c0_10, %c0_11] : memref<256x128xf32, #tpu.memory_space<vmem>>, vector<256x128xf32>
    %c0_12 = arith.constant 0 : index
    %c0_13 = arith.constant 0 : index
    %23 = vector.load %arg5[%c0_12, %c0_13] : memref<256x128xf32, #tpu.memory_space<vmem>>, vector<256x128xf32>
    %cst_14 = arith.constant dense<0.000000e+00> : vector<256x128xf32>
    %24 = tpu.matmul %16, %23, %cst_14 {dimension_numbers = #tpu.dot_dimension_numbers<[1], [0], [0], [1], [0, 0, 1, 1], [], []>} : vector<256x256xf32>, vector<256x128xf32>, vector<256x128xf32> -> vector<256x128xf32>
    %25 = arith.addf %22, %24 : vector<256x128xf32>
    %c0_15 = arith.constant 0 : index
    %c0_16 = arith.constant 0 : index
    %26 = vector.load %arg8[%c0_15, %c0_16] : memref<256x128xf32, #tpu.memory_space<vmem>>, vector<256x128xf32>
    tpu.vector_store %arg8[%c0_15, %c0_16], %25 {strides = array<i32>} : memref<256x128xf32, #tpu.memory_space<vmem>>, vector<256x128xf32>,
    %c0_i32_17 = arith.constant 0 : i32
    %27 = arith.cmpi eq, %arg1, %c0_i32_17 : i32
    %28 = arith.extui %27 : i1 to i32
    %c0_i32_18 = arith.constant 0 : i32
    %29 = arith.cmpi ne, %28, %c0_i32_18 : i32
    scf.if %29 {
      %c0_19 = arith.constant 0 : index
      %c0_20 = arith.constant 0 : index
      %30 = vector.load %arg7[%c0_19, %c0_20] : memref<256x128xf32, #tpu.memory_space<vmem>>, vector<256x128xf32>
      %c0_21 = arith.constant 0 : index
      %c0_22 = arith.constant 0 : index
      %31 = vector.load %arg8[%c0_21, %c0_22] : memref<256x128xf32, #tpu.memory_space<vmem>>, vector<256x128xf32>
      %32 = arith.mulf %30, %31 : vector<256x128xf32>
      %cst_23 = arith.constant dense<0.000000e+00> : vector<256xf32>
      %33 = vector.multi_reduction <add>, %32, %cst_23 [1] : vector<256x128xf32> to vector<256xf32>
      %34 = vector.shape_cast %33 : vector<256xf32> to vector<1x256xf32>
      %c0_24 = arith.constant 0 : index
      %c0_25 = arith.constant 0 : index
      %35 = vector.load %arg6[%c0_24, %c0_25] : memref<1x256xf32, #tpu.memory_space<vmem>>, vector<1x256xf32>
      tpu.vector_store %arg6[%c0_24, %c0_25], %34 {strides = array<i32>} : memref<1x256xf32, #tpu.memory_space<vmem>>, vector<1x256xf32>,
    } else {
    }
    return
  }
  func.func @transform_0(%arg0: i32, %arg1: i32) -> (i32, i32) {
    %c0_i32 = arith.constant 0 : i32
    %c0_i32_0 = arith.constant 0 : i32
    return %arg0, %c0_i32 : i32, i32
  }
  func.func @transform_1(%arg0: i32, %arg1: i32) -> (i32, i32) {
    %c0_i32 = arith.constant 0 : i32
    %c0_i32_0 = arith.constant 0 : i32
    return %arg0, %c0_i32 : i32, i32
  }
  func.func @transform_2(%arg0: i32, %arg1: i32) -> (i32, i32) {
    %c0_i32 = arith.constant 0 : i32
    %c0_i32_0 = arith.constant 0 : i32
    return %arg1, %c0_i32 : i32, i32
  }
  func.func @transform_3(%arg0: i32, %arg1: i32) -> (i32, i32) {
    %c0_i32 = arith.constant 0 : i32
    %c0_i32_0 = arith.constant 0 : i32
    return %arg1, %c0_i32 : i32, i32
  }
  func.func @transform_4(%arg0: i32, %arg1: i32) -> (i32, i32) {
    %c0_i32 = arith.constant 0 : i32
    %c0_i32_0 = arith.constant 0 : i32
    return %arg0, %c0_i32 : i32, i32
  }
}

</mosaic_0001>

<bundles_post_ra>
// kernel: tpu_custom_call.1
= control target key start
LH: loop header
LB: loop body
LE: loop exit
PB: predicated region body
PF: predicated region fallthrough
CT: control target
= control target key end

     0   :  { %v4830_v2 = vmov 0   ;;  %v4831_v5 = vmov 0.0   ;;  %s6215_s0 = inlined_call_operand.vmem [shape: s32[256,1], index: 0, kind: input, shape index: {}]   ;;  %s6216_s1 = inlined_call_operand.vmem [shape: s32[256,1], index: 1, kind: input, shape index: {}]   ;;  %s6217_s2 = inlined_call_operand.vmem [shape: f32[256,128], index: 2, kind: input, shape index: {}]   ;;  %s6218_s3 = inlined_call_operand.vmem [shape: f32[256,128], index: 3, kind: input, shape index: {}]   ;;  %s6219_s4 = inlined_call_operand.hbm [shape: f32[1,256], index: 4, kind: output, shape index: {}]  }
   0x1   :  { %v94_v0 = vld [vmem:[%s6215_s0 + $0x8] sm:$0xff]  ;;  %v93_v1 = vld [vmem:[%s6215_s0] sm:$0xff]  ;;  %4807 = vset.pattern.permute.xlu1 %v4830_v2  ;;  %4806 = vset.pattern.permute.xlu0 %v4830_v2  ;;  %v415_v6 = vld [vmem:[%s6216_s1 + $0x10] sm:$0xff] }
   0x2   :  { %129 = vperm.xlu1 %4807, %v94_v0   ;;  %126 = vperm.xlu0 %4806, %v93_v1   ;;  %v414_v3 = vld [vmem:[%s6216_s1 + $0x8] sm:$0xff]  ;;  %v413_v4 = vld [vmem:[%s6216_s1] sm:$0xff]  ;;  %v95_v7 = vld [vmem:[%s6215_s0 + $0x10] sm:$0xff] }
   0x3   :  { %797 = vmatprep.subr.mxu0 %v4831_v5  ;;  %1150 = vmatprep.subr.mxu1 %v4831_v5  ;;  %v780_v8 = vld [vmem:[%s6217_s2 + $0x78] sm:$0xff]  ;;  %v779_v11 = vld [vmem:[%s6217_s2 + $0x70] sm:$0xff]  ;;  %v778_v13 = vld [vmem:[%s6217_s2 + $0x68] sm:$0xff] }
   0x4   :  { %v416_v9 = vld [vmem:[%s6216_s1 + $0x18] sm:$0xff]  ;;  %798 = vmatpush1.msra.mxu0 %v780_v8  ;;  %v1132_v14 = vld [vmem:[%s6218_s3 + $0x70] sm:$0xff]  ;;  %v417_v15 = vld [vmem:[%s6216_s1 + $0x20] sm:$0xff] }
   0x5   :  { %v96_v10 = vld [vmem:[%s6215_s0 + $0x18] sm:$0xff]  ;;  %799 = vmatprep.subr.mxu0 %v4831_v5  ;;  %v97_v16 = vld [vmem:[%s6215_s0 + $0x20] sm:$0xff]  ;;  %v1131_v18 = vld [vmem:[%s6218_s3 + $0x68] sm:$0xff] }
   0x6   :  { %449 = vperm.xlu1 %4807, %v414_v3   ;;  %446 = vperm.xlu0 %4806, %v413_v4   ;;  %v1133_v12 = vld [vmem:[%s6218_s3 + $0x78] sm:$0xff]  ;;  %v777_v17 = vld [vmem:[%s6217_s2 + $0x60] sm:$0xff]  ;;  %v418_v21 = vld [vmem:[%s6216_s1 + $0x28] sm:$0xff] }
   0x7   :  { %800 = vmatpush1.msra.mxu0 %v779_v11  ;;  %1151 = vmatpush1.msra.mxu1 %v1133_v12  ;;  %v776_v19 = vld [vmem:[%s6217_s2 + $0x58] sm:$0xff]  ;;  %v1130_v20 = vld [vmem:[%s6218_s3 + $0x60] sm:$0xff]  ;;  %v98_v22 = vld [vmem:[%s6215_s0 + $0x28] sm:$0xff] }
   0x8   :  { %801 = vmatprep.subr.mxu0 %v4831_v5  ;;  %1152 = vmatprep.subr.mxu1 %v4831_v5  ;;  %v775_v23 = vld [vmem:[%s6217_s2 + $0x50] sm:$0xff]  ;;  %v1129_v24 = vld [vmem:[%s6218_s3 + $0x58] sm:$0xff]  ;;  %v774_v27 = vld [vmem:[%s6217_s2 + $0x48] sm:$0xff] }
   0x9   :  { %802 = vmatpush1.msra.mxu0 %v778_v13  ;;  %1153 = vmatpush1.msra.mxu1 %v1132_v14  ;;  %v419_v25 = vld [vmem:[%s6216_s1 + $0x30] sm:$0xff]  ;;  %v773_v29 = vld [vmem:[%s6217_s2 + $0x40] sm:$0xff]  ;;  %v1127_v30 = vld [vmem:[%s6218_s3 + $0x48] sm:$0xff] }
   0xa   :  { %452 = vperm.xlu1 %4807, %v415_v6   ;;  %132 = vperm.xlu0 %4806, %v95_v7   ;;  %v99_v26 = vld [vmem:[%s6215_s0 + $0x30] sm:$0xff]  ;;  %v420_v31 = vld [vmem:[%s6216_s1 + $0x38] sm:$0xff]  ;;  %v1126_v34 = vld [vmem:[%s6218_s3 + $0x40] sm:$0xff] }
   0xb   :  { %803 = vmatprep.subr.mxu0 %v4831_v5  ;;  %1154 = vmatprep.subr.mxu1 %v4831_v5  ;;  %v1128_v28 = vld [vmem:[%s6218_s3 + $0x50] sm:$0xff]  ;;  %v100_v32 = vld [vmem:[%s6215_s0 + $0x38] sm:$0xff]  ;;  %v421_v35 = vld [vmem:[%s6216_s1 + $0x40] sm:$0xff] }
   0xc   :  { %804 = vmatpush1.msra.mxu0 %v777_v17  ;;  %1155 = vmatpush1.msra.mxu1 %v1131_v18  ;;  %v772_v33 = vld [vmem:[%s6217_s2 + $0x38] sm:$0xff]  ;;  %v101_v36 = vld [vmem:[%s6215_s0 + $0x40] sm:$0xff]  ;;  %v771_v37 = vld [vmem:[%s6217_s2 + $0x30] sm:$0xff] }
   0xd   :  { %805 = vmatprep.subr.mxu0 %v4831_v5  ;;  %1156 = vmatprep.subr.mxu1 %v4831_v5  ;;  %v1125_v38 = vld [vmem:[%s6218_s3 + $0x38] sm:$0xff]  ;;  %v770_v39 = vld [vmem:[%s6217_s2 + $0x28] sm:$0xff]  ;;  %v1124_v40 = vld [vmem:[%s6218_s3 + $0x30] sm:$0xff] }
   0xe   :  { %455 = vperm.xlu1 %4807, %v416_v9   ;;  %135 = vperm.xlu0 %4806, %v96_v10   ;;  %v422_v41 = vld [vmem:[%s6216_s1 + $0x48] sm:$0xff]  ;;  %v769_v43 = vld [vmem:[%s6217_s2 + $0x20] sm:$0xff]  ;;  %v423_v45 = vld [vmem:[%s6216_s1 + $0x50] sm:$0xff] }
   0xf   :  { %806 = vmatpush1.msra.mxu0 %v776_v19  ;;  %1157 = vmatpush1.msra.mxu1 %v1130_v20  ;;  %v102_v42 = vld [vmem:[%s6215_s0 + $0x48] sm:$0xff]  ;;  %v103_v46 = vld [vmem:[%s6215_s0 + $0x50] sm:$0xff]  ;;  %v768_v47 = vld [vmem:[%s6217_s2 + $0x18] sm:$0xff] }
  0x10   :  { %807 = vmatprep.subr.mxu0 %v4831_v5  ;;  %1158 = vmatprep.subr.mxu1 %v4831_v5  ;;  %v1123_v44 = vld [vmem:[%s6218_s3 + $0x28] sm:$0xff]  ;;  %v1122_v48 = vld [vmem:[%s6218_s3 + $0x20] sm:$0xff]  ;;  %v767_v49 = vld [vmem:[%s6217_s2 + $0x10] sm:$0xff] }
  0x11   :  { %808 = vmatpush1.msra.mxu0 %v775_v23  ;;  %1159 = vmatpush1.msra.mxu1 %v1129_v24  ;;  %v1121_v50 = vld [vmem:[%s6218_s3 + $0x18] sm:$0xff] }
  0x12   :  { %458 = vperm.xlu1 %4807, %v417_v15   ;;  %138 = vperm.xlu0 %4806, %v97_v16  }
  0x13   :  { %809 = vmatprep.subr.mxu0 %v4831_v5  ;;  %1160 = vmatprep.subr.mxu1 %v4831_v5 }
  0x14   :  { %810 = vmatpush1.msra.mxu0 %v774_v27  ;;  %1161 = vmatpush1.msra.mxu1 %v1128_v28 }
  0x15   :  { %811 = vmatprep.subr.mxu0 %v4831_v5  ;;  %1162 = vmatprep.subr.mxu1 %v4831_v5 }
  0x16   :  { %461 = vperm.xlu1 %4807, %v418_v21   ;;  %141 = vperm.xlu0 %4806, %v98_v22  }
  0x17   :  { %812 = vmatpush1.msra.mxu0 %v773_v29  ;;  %1163 = vmatpush1.msra.mxu1 %v1127_v30 }
  0x18   :  { %813 = vmatprep.subr.mxu0 %v4831_v5  ;;  %1164 = vmatprep.subr.mxu1 %v4831_v5 }
  0x19   :  { %814 = vmatpush1.msra.mxu0 %v772_v33  ;;  %1165 = vmatpush1.msra.mxu1 %v1126_v34 }
  0x1a   :  { %464 = vperm.xlu1 %4807, %v419_v25   ;;  %144 = vperm.xlu0 %4806, %v99_v26  }
  0x1b   :  { %815 = vmatprep.subr.mxu0 %v4831_v5  ;;  %1166 = vmatprep.subr.mxu1 %v4831_v5 }
  0x1c   :  { %816 = vmatpush1.msra.mxu0 %v771_v37  ;;  %1167 = vmatpush1.msra.mxu1 %v1125_v38 }
  0x1d   :  { %817 = vmatprep.subr.mxu0 %v4831_v5  ;;  %1168 = vmatprep.subr.mxu1 %v4831_v5 }
  0x1e   :  { %467 = vperm.xlu1 %4807, %v420_v31   ;;  %147 = vperm.xlu0 %4806, %v100_v32  }
  0x1f   :  { %818 = vmatpush1.msra.mxu0 %v770_v39  ;;  %1169 = vmatpush1.msra.mxu1 %v1124_v40 }
  0x20   :  { %819 = vmatprep.subr.mxu0 %v4831_v5  ;;  %1170 = vmatprep.subr.mxu1 %v4831_v5 }
  0x21   :  { %820 = vmatpush1.msra.mxu0 %v769_v43  ;;  %1171 = vmatpush1.msra.mxu1 %v1123_v44 }
  0x22   :  { %470 = vperm.xlu1 %4807, %v421_v35   ;;  %150 = vperm.xlu0 %4806, %v101_v36  }
  0x23   :  { %821 = vmatprep.subr.mxu0 %v4831_v5  ;;  %1172 = vmatprep.subr.mxu1 %v4831_v5 }
  0x26   :  { %473 = vperm.xlu1 %4807, %v422_v41   ;;  %153 = vperm.xlu0 %4806, %v102_v42  }
  0x2a   :  { %476 = vperm.xlu1 %4807, %v423_v45   ;;  %156 = vperm.xlu0 %4806, %v103_v46  }
  0x2b   :  { %9 = vsyncpa [#allocation5], 0  ;;  %v424_v51 = vld [vmem:[%s6216_s1 + $0x58] sm:$0xff]  ;;  %822 = vmatpush1.msra.mxu0 %v768_v47  ;;  %1173 = vmatpush1.msra.mxu1 %v1122_v48  ;;  %v766_v53 = vld [vmem:[%s6217_s2 + $0x8] sm:$0xff] }
  0x2c   :  { %v104_v52 = vld [vmem:[%s6215_s0 + $0x58] sm:$0xff]  ;;  %823 = vmatprep.subr.mxu0 %v4831_v5  ;;  %1174 = vmatprep.subr.mxu1 %v4831_v5  ;;  %v1120_v54 = vld [vmem:[%s6218_s3 + $0x10] sm:$0xff]  ;;  %v425_v55 = vld [vmem:[%s6216_s1 + $0x60] sm:$0xff] }
  0x2d   :  { %824 = vmatpush1.msra.mxu0 %v767_v49  ;;  %1175 = vmatpush1.msra.mxu1 %v1121_v50  ;;  %v105_v56 = vld [vmem:[%s6215_s0 + $0x60] sm:$0xff]  ;;  %v1119_v58 = vld [vmem:[%s6218_s3 + $0x8] sm:$0xff]  ;;  %v796_v59 = vld [vmem:[%s6217_s2 + $0xf8] sm:$0xff] }
  0x2e   :  { %479 = vperm.xlu1 %4807, %v424_v51   ;;  %159 = vperm.xlu0 %4806, %v104_v52   ;;  %v765_v57 = vld [vmem:[%s6217_s2] sm:$0xff]  ;;  %v426_v61 = vld [vmem:[%s6216_s1 + $0x68] sm:$0xff]  ;;  %v795_v63 = vld [vmem:[%s6217_s2 + $0xf0] sm:$0xff] }
  0x2f   :  { %825 = vmatprep.subr.mxu0 %v4831_v5  ;;  %1176 = vmatprep.subr.mxu1 %v4831_v5  ;;  %v1118_v60 = vld [vmem:[%s6218_s3] sm:$0xff]  ;;  %v106_v62 = vld [vmem:[%s6215_s0 + $0x68] sm:$0xff]  ;;  %v1149_v0 = vld [vmem:[%s6218_s3 + $0xf8] sm:$0xff] }
  0x30   :  { %826 = vmatpush1.msra.mxu0 %v766_v53  ;;  %1177 = vmatpush1.msra.mxu1 %v1120_v54  ;;  %v427_v1 = vld [vmem:[%s6216_s1 + $0x70] sm:$0xff]  ;;  %v794_v3 = vld [vmem:[%s6217_s2 + $0xe8] sm:$0xff]  ;;  %v793_v6 = vld [vmem:[%s6217_s2 + $0xe0] sm:$0xff] }
  0x31   :  { %827 = vmatprep.subr.mxu0 %v4831_v5  ;;  %1178 = vmatprep.subr.mxu1 %v4831_v5  ;;  %v107_v2 = vld [vmem:[%s6215_s0 + $0x70] sm:$0xff]  ;;  %v1147_v7 = vld [vmem:[%s6218_s3 + $0xe8] sm:$0xff]  ;;  %v428_v8 = vld [vmem:[%s6216_s1 + $0x78] sm:$0xff] }
  0x32   :  { %482 = vperm.xlu1 %4807, %v425_v55   ;;  %162 = vperm.xlu0 %4806, %v105_v56   ;;  %v1148_v4 = vld [vmem:[%s6218_s3 + $0xf0] sm:$0xff]  ;;  %v108_v9 = vld [vmem:[%s6215_s0 + $0x78] sm:$0xff]  ;;  %v1146_v11 = vld [vmem:[%s6218_s3 + $0xe0] sm:$0xff] }
  0x33   :  { %828 = vmatpush1.msra.mxu0 %v765_v57  ;;  %1179 = vmatpush1.msra.mxu1 %v1119_v58  ;;  %v792_v10 = vld [vmem:[%s6217_s2 + $0xd8] sm:$0xff]  ;;  %v429_v12 = vld [vmem:[%s6216_s1 + $0x80] sm:$0xff]  ;;  %v791_v14 = vld [vmem:[%s6217_s2 + $0xd0] sm:$0xff] }
  0x34   :  { %829 = vmatprep.subr.mxu0 %v4831_v5  ;;  %1180 = vmatprep.subr.mxu1 %v4831_v5  ;;  %v109_v13 = vld [vmem:[%s6215_s0 + $0x80] sm:$0xff]  ;;  %v1145_v15 = vld [vmem:[%s6218_s3 + $0xd8] sm:$0xff]  ;;  %v790_v16 = vld [vmem:[%s6217_s2 + $0xc8] sm:$0xff] }
  0x35   :  { %830 = vmatpush2.msra.mxu0 %v796_v59  ;;  %1181 = vmatpush1.msra.mxu1 %v1118_v60  ;;  %v1144_v17 = vld [vmem:[%s6218_s3 + $0xd0] sm:$0xff]  ;;  %v430_v18 = vld [vmem:[%s6216_s1 + $0x88] sm:$0xff]  ;;  %v789_v20 = vld [vmem:[%s6217_s2 + $0xc0] sm:$0xff]  ;;  %v86_v60 = vlaneseq }
  0x36   :  { %485 = vperm.xlu1 %4807, %v426_v61   ;;  %165 = vperm.xlu0 %4806, %v106_v62   ;;  %v110_v19 = vld [vmem:[%s6215_s0 + $0x88] sm:$0xff]  ;;  %v431_v22 = vld [vmem:[%s6216_s1 + $0x90] sm:$0xff]  ;;  %v788_v24 = vld [vmem:[%s6217_s2 + $0xb8] sm:$0xff] }
  0x37   :  { %831 = vmatprep.subr.mxu0 %v4831_v5  ;;  %1182 = vmatprep.subr.mxu1 %v4831_v5  ;;  %v1143_v21 = vld [vmem:[%s6218_s3 + $0xc8] sm:$0xff]  ;;  %v111_v23 = vld [vmem:[%s6215_s0 + $0x90] sm:$0xff]  ;;  %v1142_v25 = vld [vmem:[%s6218_s3 + $0xc0] sm:$0xff] }
  0x38   :  { %832 = vmatpush2.msra.mxu0 %v795_v63  ;;  %1183 = vmatpush2.msra.mxu1 %v1149_v0  ;;  %v787_v26 = vld [vmem:[%s6217_s2 + $0xb0] sm:$0xff]  ;;  %v1141_v27 = vld [vmem:[%s6218_s3 + $0xb8] sm:$0xff]  ;;  %v786_v30 = vld [vmem:[%s6217_s2 + $0xa8] sm:$0xff]  ;;  %v5297_v63 = vand.u32 127, %v86_v60 }
  0x39   :  { %833 = vmatprep.subr.mxu0 %v4831_v5  ;;  %1184 = vmatprep.subr.mxu1 %v4831_v5  ;;  %v432_v28 = vld [vmem:[%s6216_s1 + $0x98] sm:$0xff]  ;;  %v1140_v31 = vld [vmem:[%s6218_s3 + $0xb0] sm:$0xff]  ;;  %v433_v32 = vld [vmem:[%s6216_s1 + $0xa0] sm:$0xff] }
  0x3a   :  { %488 = vperm.xlu1 %4807, %v427_v1   ;;  %168 = vperm.xlu0 %4806, %v107_v2   ;;  %v112_v29 = vld [vmem:[%s6215_s0 + $0x98] sm:$0xff]  ;;  %v113_v33 = vld [vmem:[%s6215_s0 + $0xa0] sm:$0xff]  ;;  %v1139_v35 = vld [vmem:[%s6218_s3 + $0xa8] sm:$0xff]  ;;  %v5306_v2 = vadd.s32 128, %v5297_v63 }
  0x3b   :  { %834 = vmatpush2.msra.mxu0 %v794_v3  ;;  %1185 = vmatpush2.msra.mxu1 %v1148_v4  ;;  %v785_v34 = vld [vmem:[%s6217_s2 + $0xa0] sm:$0xff]  ;;  %v784_v36 = vld [vmem:[%s6217_s2 + $0x98] sm:$0xff]  ;;  %v434_v38 = vld [vmem:[%s6216_s1 + $0xa8] sm:$0xff] }
  0x3c   :  { %835 = vmatprep.subr.mxu0 %v4831_v5  ;;  %1186 = vmatprep.subr.mxu1 %v4831_v5  ;;  %v1138_v37 = vld [vmem:[%s6218_s3 + $0xa0] sm:$0xff]  ;;  %v114_v39 = vld [vmem:[%s6215_s0 + $0xa8] sm:$0xff]  ;;  %v783_v40 = vld [vmem:[%s6217_s2 + $0x90] sm:$0xff] }
  0x3d   :  { %836 = vmatpush2.msra.mxu0 %v793_v6  ;;  %1187 = vmatpush2.msra.mxu1 %v1147_v7  ;;  %v1137_v41 = vld [vmem:[%s6218_s3 + $0x98] sm:$0xff]  ;;  %v435_v42 = vld [vmem:[%s6216_s1 + $0xb0] sm:$0xff]  ;;  %v782_v44 = vld [vmem:[%s6217_s2 + $0x88] sm:$0xff] }
  0x3e   :  { %491 = vperm.xlu1 %4807, %v428_v8   ;;  %171 = vperm.xlu0 %4806, %v108_v9   ;;  %v115_v43 = vld [vmem:[%s6215_s0 + $0xb0] sm:$0xff]  ;;  %v781_v46 = vld [vmem:[%s6217_s2 + $0x80] sm:$0xff]  ;;  %v1135_v47 = vld [vmem:[%s6218_s3 + $0x88] sm:$0xff]  ;;  %v4832_v8 = vmov 1.0  }
  0x3f   :  { %837 = vmatprep.subr.mxu0 %v4831_v5  ;;  %1188 = vmatprep.subr.mxu1 %v4831_v5  ;;  %v1136_v45 = vld [vmem:[%s6218_s3 + $0x90] sm:$0xff]  ;;  %v436_v48 = vld [vmem:[%s6216_s1 + $0xb8] sm:$0xff]  ;;  %v1134_v50 = vld [vmem:[%s6218_s3 + $0x80] sm:$0xff] }
  0x40   :  { %838 = vmatpush2.msra.mxu0 %v792_v10  ;;  %1189 = vmatpush2.msra.mxu1 %v1146_v11  ;;  %v116_v49 = vld [vmem:[%s6215_s0 + $0xb8] sm:$0xff]  ;;  %v437_v51 = vld [vmem:[%s6216_s1 + $0xc0] sm:$0xff]  ;;  %v438_v53 = vld [vmem:[%s6216_s1 + $0xc8] sm:$0xff] }
  0x41   :  { %839 = vmatprep.subr.mxu0 %v4831_v5  ;;  %1190 = vmatprep.subr.mxu1 %v4831_v5  ;;  %v117_v52 = vld [vmem:[%s6215_s0 + $0xc0] sm:$0xff]  ;;  %v118_v54 = vld [vmem:[%s6215_s0 + $0xc8] sm:$0xff]  ;;  %v439_v55 = vld [vmem:[%s6216_s1 + $0xd0] sm:$0xff] }
  0x42   :  { %494 = vperm.xlu1 %4807, %v429_v12   ;;  %174 = vperm.xlu0 %4806, %v109_v13   ;;  %v440_v56 = vld [vmem:[%s6216_s1 + $0xd8] sm:$0xff]  ;;  %v441_v58 = vld [vmem:[%s6216_s1 + $0xe0] sm:$0xff]  ;;  %v442_v61 = vld [vmem:[%s6216_s1 + $0xe8] sm:$0xff] }
  0x43   :  { %840 = vmatpush2.msra.mxu0 %v791_v14  ;;  %1191 = vmatpush2.msra.mxu1 %v1145_v15  ;;  %v120_v57 = vld [vmem:[%s6215_s0 + $0xd8] sm:$0xff]  ;;  %v121_v59 = vld [vmem:[%s6215_s0 + $0xe0] sm:$0xff]  ;;  %v122_v62 = vld [vmem:[%s6215_s0 + $0xe8] sm:$0xff] }
  0x44   :  { %841 = vmatprep.subr.mxu0 %v4831_v5  ;;  %1192 = vmatprep.subr.mxu1 %v4831_v5  ;;  %v443_v0 = vld [vmem:[%s6216_s1 + $0xf0] sm:$0xff]  ;;  %v444_v3 = vld [vmem:[%s6216_s1 + $0xf8] sm:$0xff] }
  0x45   :  { %842 = vmatpush2.msra.mxu0 %v790_v16  ;;  %1193 = vmatpush2.msra.mxu1 %v1144_v17  ;;  %v123_v1 = vld [vmem:[%s6215_s0 + $0xf0] sm:$0xff]  ;;  %v124_v4 = vld [vmem:[%s6215_s0 + $0xf8] sm:$0xff] }
  0x46   :  { %497 = vperm.xlu1 %4807, %v430_v18   ;;  %177 = vperm.xlu0 %4806, %v110_v19  }
  0x47   :  { %843 = vmatprep.subr.mxu0 %v4831_v5  ;;  %1194 = vmatprep.subr.mxu1 %v4831_v5 }
  0x48   :  { %844 = vmatpush2.msra.mxu0 %v789_v20  ;;  %1195 = vmatpush2.msra.mxu1 %v1143_v21 }
  0x49   :  { %845 = vmatprep.subr.mxu0 %v4831_v5  ;;  %1196 = vmatprep.subr.mxu1 %v4831_v5 }
  0x4a   :  { %500 = vperm.xlu1 %4807, %v431_v22   ;;  %180 = vperm.xlu0 %4806, %v111_v23  }
  0x4b   :  { %846 = vmatpush2.msra.mxu0 %v788_v24  ;;  %1197 = vmatpush2.msra.mxu1 %v1142_v25 }
  0x4c   :  { %847 = vmatprep.subr.mxu0 %v4831_v5  ;;  %1198 = vmatprep.subr.mxu1 %v4831_v5 }
  0x4d   :  { %848 = vmatpush2.msra.mxu0 %v787_v26  ;;  %1199 = vmatpush2.msra.mxu1 %v1141_v27 }
  0x4e   :  { %503 = vperm.xlu1 %4807, %v432_v28   ;;  %183 = vperm.xlu0 %4806, %v112_v29  }
  0x4f   :  { %849 = vmatprep.subr.mxu0 %v4831_v5  ;;  %1200 = vmatprep.subr.mxu1 %v4831_v5 }
  0x50   :  { %850 = vmatpush2.msra.mxu0 %v786_v30  ;;  %1201 = vmatpush2.msra.mxu1 %v1140_v31 }
  0x51   :  { %851 = vmatprep.subr.mxu0 %v4831_v5  ;;  %1202 = vmatprep.subr.mxu1 %v4831_v5 }
  0x52   :  { %506 = vperm.xlu1 %4807, %v433_v32   ;;  %186 = vperm.xlu0 %4806, %v113_v33  }
  0x53   :  { %852 = vmatpush2.msra.mxu0 %v785_v34  ;;  %1203 = vmatpush2.msra.mxu1 %v1139_v35 }
  0x54   :  { %853 = vmatprep.subr.mxu0 %v4831_v5  ;;  %1204 = vmatprep.subr.mxu1 %v4831_v5 }
  0x55   :  { %854 = vmatpush2.msra.mxu0 %v784_v36  ;;  %1205 = vmatpush2.msra.mxu1 %v1138_v37 }
  0x56   :  { %509 = vperm.xlu1 %4807, %v434_v38   ;;  %189 = vperm.xlu0 %4806, %v114_v39  }
  0x57   :  { %855 = vmatprep.subr.mxu0 %v4831_v5  ;;  %1206 = vmatprep.subr.mxu1 %v4831_v5 }
  0x58   :  { %856 = vmatpush2.msra.mxu0 %v783_v40  ;;  %1207 = vmatpush2.msra.mxu1 %v1137_v41 }
  0x59   :  { %857 = vmatprep.subr.mxu0 %v4831_v5  ;;  %1208 = vmatprep.subr.mxu1 %v4831_v5 }
  0x5a   :  { %512 = vperm.xlu1 %4807, %v435_v42   ;;  %192 = vperm.xlu0 %4806, %v115_v43  }
  0x5b   :  { %858 = vmatpush2.msra.mxu0 %v782_v44  ;;  %1209 = vmatpush2.msra.mxu1 %v1136_v45 }
  0x5c   :  { %859 = vmatprep.subr.mxu0 %v4831_v5  ;;  %1210 = vmatprep.subr.mxu1 %v4831_v5 }
  0x5d   :  { %860 = vmatpush2.msra.mxu0 %v781_v46  ;;  %1211 = vmatpush2.msra.mxu1 %v1135_v47 }
  0x5e   :  { %515 = vperm.xlu1 %4807, %v436_v48   ;;  %195 = vperm.xlu0 %4806, %v116_v49  }
  0x5f   :  { %1212 = vmatprep.subr.mxu1 %v4831_v5  ;;  %v119_v5 = vld [vmem:[%s6215_s0 + $0xd0] sm:$0xff]  ;;  %s4834_s0 = smov [#allocation4]  }
  0x60   :  { %1213 = vmatpush2.msra.mxu1 %v1134_v50  ;;  %s4537_s1 = sshll.u32 %s4834_s0, 4  ;;  %s4538_s1 = int_to_ptr.vmem [resolvable:$true] %s4537_s1 }
  0x61   :  { %s4808_s8 = scalar_lea.vmem %s4538_s1, 32  ;;  %p4813_p1 = scmp.lt.s32.totalorder %s4538_s1, %s4538_s1 }
  0x62   :  { %518 = vperm.xlu1 %4807, %v437_v51   ;;  %198 = vperm.xlu0 %4806, %v117_v52   ;;  %p4809_p0 = scmp.ne.s32.totalorder %s4538_s1, %s4808_s8  ;;  %p4814_p2 = scmp.lt.s32.totalorder %s4808_s8, %s4808_s8 }
  0x64   :  { %p4815_p3 = por %p4814_p2, %p4813_p1 }
  0x66   :  { %521 = vperm.xlu1 %4807, %v438_v53   ;;  %201 = vperm.xlu0 %4806, %v118_v54   ;;  %p4816_p4 = pnand %p4815_p3, %p4809_p0 }
  0x6a   :  { %524 = vperm.xlu1 %4807, %v439_v55   ;;  %204 = vperm.xlu0 %4806, %v119_v5  }
  0x6e   :  { %527 = vperm.xlu1 %4807, %v440_v56   ;;  %207 = vperm.xlu0 %4806, %v120_v57  }
  0x72   :  { %530 = vperm.xlu1 %4807, %v441_v58   ;;  %210 = vperm.xlu0 %4806, %v121_v59  }
  0x76   :  { %533 = vperm.xlu1 %4807, %v442_v61   ;;  %213 = vperm.xlu0 %4806, %v122_v62  }
  0x7a   :  { %536 = vperm.xlu1 %4807, %v443_v0   ;;  %216 = vperm.xlu0 %4806, %v123_v1  }
  0x7d   :  { %v130_v6 = vpop.permute.xlu1 %129  ;;  %v127_v7 = vpop.permute.xlu0 %126 }
  0x7e   :  { %539 = vperm.xlu1 %4807, %v444_v3   ;;  %219 = vperm.xlu0 %4806, %v124_v4   ;;  %vm222_vm0 = vcmp.eq.s32.totalorder %v5306_v2, %v127_v7  ;;  %vm221_vm1 = vcmp.eq.s32.totalorder %v5297_v63, %v127_v7  ;;  %vm224_vm2 = vcmp.eq.s32.totalorder %v5306_v2, %v130_v6 }
  0x7f   :  { %4673 = vmatprep.mubr.msk.f32.mxu0 %vm222_vm0, %v4832_v8  ;;  %vm223_vm3 = vcmp.eq.s32.totalorder %v5297_v63, %v130_v6 }
  0x80   :  { %4674 = vmatmul.mubr.msk.f32.vlgmr.msra.gmra.mxu0 %vm221_vm1, %v4832_v8 }
  0x81   :  { %v450_v9 = vpop.permute.xlu1 %449  ;;  %v447_v10 = vpop.permute.xlu0 %446  ;;  %4675 = vmatprep.mubr.msk.f32.mxu0 %vm224_vm2, %v4832_v8 }
  0x82   :  { %vm542_vm4 = vcmp.eq.s32.totalorder %v5306_v2, %v447_v10  ;;  %vm541_vm5 = vcmp.eq.s32.totalorder %v5297_v63, %v447_v10  ;;  %vm544_vm6 = vcmp.eq.s32.totalorder %v5306_v2, %v450_v9  ;;  %vm543_vm9 = vcmp.eq.s32.totalorder %v5297_v63, %v450_v9 }
  0x83   :  { %4737 = vmatprep.mubr.msk.f32.mxu1 %vm542_vm4, %v4832_v8 }
  0x84   :  { %4676 = vmatmul.mubr.msk.f32.gmra.mxu0 %vm223_vm3, %v4832_v8  ;;  %4738 = vmatmul.mubr.msk.f32.vlgmr.msra.gmra.mxu1 %vm541_vm5, %v4832_v8 }
  0x85   :  { %v453_v11 = vpop.permute.xlu1 %452  ;;  %v133_v12 = vpop.permute.xlu0 %132  ;;  %4739 = vmatprep.mubr.msk.f32.mxu1 %vm544_vm6, %v4832_v8 }
  0x86   :  { %vm226_vm7 = vcmp.eq.s32.totalorder %v5306_v2, %v133_v12  ;;  %vm225_vm8 = vcmp.eq.s32.totalorder %v5297_v63, %v133_v12  ;;  %vm546_vm10 = vcmp.eq.s32.totalorder %v5306_v2, %v453_v11  ;;  %vm545_vm13 = vcmp.eq.s32.totalorder %v5297_v63, %v453_v11 }
  0x87   :  { %4677 = vmatprep.mubr.msk.f32.mxu0 %vm226_vm7, %v4832_v8 }
  0x88   :  { %4678 = vmatmul.mubr.msk.f32.gmra.mxu0 %vm225_vm8, %v4832_v8  ;;  %4740 = vmatmul.mubr.msk.f32.gmra.mxu1 %vm543_vm9, %v4832_v8 }
  0x89   :  { %v456_v13 = vpop.permute.xlu1 %455  ;;  %v136_v14 = vpop.permute.xlu0 %135  ;;  %4741 = vmatprep.mubr.msk.f32.mxu1 %vm546_vm10, %v4832_v8 }
  0x8a   :  { %vm228_vm11 = vcmp.eq.s32.totalorder %v5306_v2, %v136_v14  ;;  %vm227_vm12 = vcmp.eq.s32.totalorder %v5297_v63, %v136_v14  ;;  %vm548_vm14 = vcmp.eq.s32.totalorder %v5306_v2, %v456_v13  ;;  %vm547_vm1 = vcmp.eq.s32.totalorder %v5297_v63, %v456_v13 }
  0x8b   :  { %4679 = vmatprep.mubr.msk.f32.mxu0 %vm228_vm11, %v4832_v8 }
  0x8c   :  { %4680 = vmatmul.mubr.msk.f32.gmra.mxu0 %vm227_vm12, %v4832_v8  ;;  %4742 = vmatmul.mubr.msk.f32.gmra.mxu1 %vm545_vm13, %v4832_v8 }
  0x8d   :  { %v459_v15 = vpop.permute.xlu1 %458  ;;  %v139_v16 = vpop.permute.xlu0 %138  ;;  %4743 = vmatprep.mubr.msk.f32.mxu1 %vm548_vm14, %v4832_v8 }
  0x8e   :  { %vm230_vm15 = vcmp.eq.s32.totalorder %v5306_v2, %v139_v16  ;;  %vm229_vm0 = vcmp.eq.s32.totalorder %v5297_v63, %v139_v16  ;;  %vm550_vm2 = vcmp.eq.s32.totalorder %v5306_v2, %v459_v15  ;;  %vm549_vm5 = vcmp.eq.s32.totalorder %v5297_v63, %v459_v15 }
  0x8f   :  { %4681 = vmatprep.mubr.msk.f32.mxu0 %vm230_vm15, %v4832_v8 }
  0x90   :  { %4682 = vmatmul.mubr.msk.f32.gmra.mxu0 %vm229_vm0, %v4832_v8  ;;  %4744 = vmatmul.mubr.msk.f32.gmra.mxu1 %vm547_vm1, %v4832_v8 }
  0x91   :  { %v462_v17 = vpop.permute.xlu1 %461  ;;  %v142_v18 = vpop.permute.xlu0 %141  ;;  %4745 = vmatprep.mubr.msk.f32.mxu1 %vm550_vm2, %v4832_v8 }
  0x92   :  { %vm232_vm3 = vcmp.eq.s32.totalorder %v5306_v2, %v142_v18  ;;  %vm231_vm4 = vcmp.eq.s32.totalorder %v5297_v63, %v142_v18  ;;  %vm552_vm6 = vcmp.eq.s32.totalorder %v5306_v2, %v462_v17  ;;  %vm551_vm9 = vcmp.eq.s32.totalorder %v5297_v63, %v462_v17 }
  0x93   :  { %4683 = vmatprep.mubr.msk.f32.mxu0 %vm232_vm3, %v4832_v8 }
  0x94   :  { %4684 = vmatmul.mubr.msk.f32.gmra.mxu0 %vm231_vm4, %v4832_v8  ;;  %4746 = vmatmul.mubr.msk.f32.gmra.mxu1 %vm549_vm5, %v4832_v8 }
  0x95   :  { %v465_v19 = vpop.permute.xlu1 %464  ;;  %v145_v20 = vpop.permute.xlu0 %144  ;;  %4747 = vmatprep.mubr.msk.f32.mxu1 %vm552_vm6, %v4832_v8 }
  0x96   :  { %vm234_vm7 = vcmp.eq.s32.totalorder %v5306_v2, %v145_v20  ;;  %vm233_vm8 = vcmp.eq.s32.totalorder %v5297_v63, %v145_v20  ;;  %vm554_vm10 = vcmp.eq.s32.totalorder %v5306_v2, %v465_v19  ;;  %vm553_vm13 = vcmp.eq.s32.totalorder %v5297_v63, %v465_v19 }
  0x97   :  { %4685 = vmatprep.mubr.msk.f32.mxu0 %vm234_vm7, %v4832_v8 }
  0x98   :  { %4686 = vmatmul.mubr.msk.f32.gmra.mxu0 %vm233_vm8, %v4832_v8  ;;  %4748 = vmatmul.mubr.msk.f32.gmra.mxu1 %vm551_vm9, %v4832_v8 }
  0x99   :  { %v468_v21 = vpop.permute.xlu1 %467  ;;  %v148_v22 = vpop.permute.xlu0 %147  ;;  %4749 = vmatprep.mubr.msk.f32.mxu1 %vm554_vm10, %v4832_v8 }
  0x9a   :  { %vm236_vm11 = vcmp.eq.s32.totalorder %v5306_v2, %v148_v22  ;;  %vm235_vm12 = vcmp.eq.s32.totalorder %v5297_v63, %v148_v22  ;;  %vm556_vm14 = vcmp.eq.s32.totalorder %v5306_v2, %v468_v21  ;;  %vm555_vm1 = vcmp.eq.s32.totalorder %v5297_v63, %v468_v21 }
  0x9b   :  { %4687 = vmatprep.mubr.msk.f32.mxu0 %vm236_vm11, %v4832_v8 }
  0x9c   :  { %4688 = vmatmul.mubr.msk.f32.gmra.mxu0 %vm235_vm12, %v4832_v8  ;;  %4750 = vmatmul.mubr.msk.f32.gmra.mxu1 %vm553_vm13, %v4832_v8 }
  0x9d   :  { %v471_v23 = vpop.permute.xlu1 %470  ;;  %v151_v24 = vpop.permute.xlu0 %150  ;;  %4751 = vmatprep.mubr.msk.f32.mxu1 %vm556_vm14, %v4832_v8 }
  0x9e   :  { %vm238_vm15 = vcmp.eq.s32.totalorder %v5306_v2, %v151_v24  ;;  %vm237_vm0 = vcmp.eq.s32.totalorder %v5297_v63, %v151_v24  ;;  %vm558_vm2 = vcmp.eq.s32.totalorder %v5306_v2, %v471_v23  ;;  %vm557_vm5 = vcmp.eq.s32.totalorder %v5297_v63, %v471_v23 }
  0x9f   :  { %4689 = vmatprep.mubr.msk.f32.mxu0 %vm238_vm15, %v4832_v8 }
  0xa0   :  { %4690 = vmatmul.mubr.msk.f32.gmra.mxu0 %vm237_vm0, %v4832_v8  ;;  %4752 = vmatmul.mubr.msk.f32.gmra.mxu1 %vm555_vm1, %v4832_v8 }
  0xa1   :  { %v474_v25 = vpop.permute.xlu1 %473  ;;  %v154_v26 = vpop.permute.xlu0 %153  ;;  %4753 = vmatprep.mubr.msk.f32.mxu1 %vm558_vm2, %v4832_v8 }
  0xa2   :  { %vm240_vm3 = vcmp.eq.s32.totalorder %v5306_v2, %v154_v26  ;;  %vm239_vm4 = vcmp.eq.s32.totalorder %v5297_v63, %v154_v26  ;;  %vm560_vm6 = vcmp.eq.s32.totalorder %v5306_v2, %v474_v25  ;;  %vm559_vm9 = vcmp.eq.s32.totalorder %v5297_v63, %v474_v25 }
  0xa3   :  { %4691 = vmatprep.mubr.msk.f32.mxu0 %vm240_vm3, %v4832_v8 }
  0xa4   :  { %4692 = vmatmul.mubr.msk.f32.gmra.mxu0 %vm239_vm4, %v4832_v8  ;;  %4754 = vmatmul.mubr.msk.f32.gmra.mxu1 %vm557_vm5, %v4832_v8 }
  0xa5   :  { %v477_v27 = vpop.permute.xlu1 %476  ;;  %v157_v28 = vpop.permute.xlu0 %156  ;;  %4755 = vmatprep.mubr.msk.f32.mxu1 %vm560_vm6, %v4832_v8 }
  0xa6   :  { %vm242_vm7 = vcmp.eq.s32.totalorder %v5306_v2, %v157_v28  ;;  %vm241_vm8 = vcmp.eq.s32.totalorder %v5297_v63, %v157_v28  ;;  %vm562_vm10 = vcmp.eq.s32.totalorder %v5306_v2, %v477_v27  ;;  %vm561_vm13 = vcmp.eq.s32.totalorder %v5297_v63, %v477_v27 }
  0xa7   :  { %4693 = vmatprep.mubr.msk.f32.mxu0 %vm242_vm7, %v4832_v8 }
  0xa8   :  { %4694 = vmatmul.mubr.msk.f32.gmra.mxu0 %vm241_vm8, %v4832_v8  ;;  %4756 = vmatmul.mubr.msk.f32.gmra.mxu1 %vm559_vm9, %v4832_v8 }
  0xa9   :  { %v480_v29 = vpop.permute.xlu1 %479  ;;  %v160_v30 = vpop.permute.xlu0 %159  ;;  %4757 = vmatprep.mubr.msk.f32.mxu1 %vm562_vm10, %v4832_v8 }
  0xaa   :  { %vm244_vm11 = vcmp.eq.s32.totalorder %v5306_v2, %v160_v30  ;;  %vm243_vm12 = vcmp.eq.s32.totalorder %v5297_v63, %v160_v30  ;;  %vm564_vm14 = vcmp.eq.s32.totalorder %v5306_v2, %v480_v29  ;;  %vm563_vm1 = vcmp.eq.s32.totalorder %v5297_v63, %v480_v29 }
  0xab   :  { %4695 = vmatprep.mubr.msk.f32.mxu0 %vm244_vm11, %v4832_v8 }
  0xac   :  { %4696 = vmatmul.mubr.msk.f32.gmra.mxu0 %vm243_vm12, %v4832_v8  ;;  %4758 = vmatmul.mubr.msk.f32.gmra.mxu1 %vm561_vm13, %v4832_v8 }
  0xad   :  { %v483_v31 = vpop.permute.xlu1 %482  ;;  %v163_v32 = vpop.permute.xlu0 %162  ;;  %4759 = vmatprep.mubr.msk.f32.mxu1 %vm564_vm14, %v4832_v8 }
  0xae   :  { %vm246_vm15 = vcmp.eq.s32.totalorder %v5306_v2, %v163_v32  ;;  %vm245_vm0 = vcmp.eq.s32.totalorder %v5297_v63, %v163_v32  ;;  %vm566_vm2 = vcmp.eq.s32.totalorder %v5306_v2, %v483_v31  ;;  %vm565_vm5 = vcmp.eq.s32.totalorder %v5297_v63, %v483_v31 }
  0xaf   :  { %4697 = vmatprep.mubr.msk.f32.mxu0 %vm246_vm15, %v4832_v8 }
  0xb0   :  { %4698 = vmatmul.mubr.msk.f32.gmra.mxu0 %vm245_vm0, %v4832_v8  ;;  %4760 = vmatmul.mubr.msk.f32.gmra.mxu1 %vm563_vm1, %v4832_v8 }
  0xb1   :  { %v486_v33 = vpop.permute.xlu1 %485  ;;  %v166_v34 = vpop.permute.xlu0 %165  ;;  %4761 = vmatprep.mubr.msk.f32.mxu1 %vm566_vm2, %v4832_v8 }
  0xb2   :  { %vm248_vm3 = vcmp.eq.s32.totalorder %v5306_v2, %v166_v34  ;;  %vm247_vm4 = vcmp.eq.s32.totalorder %v5297_v63, %v166_v34  ;;  %vm568_vm6 = vcmp.eq.s32.totalorder %v5306_v2, %v486_v33  ;;  %vm567_vm9 = vcmp.eq.s32.totalorder %v5297_v63, %v486_v33 }
  0xb3   :  { %4699 = vmatprep.mubr.msk.f32.mxu0 %vm248_vm3, %v4832_v8 }
  0xb4   :  { %4700 = vmatmul.mubr.msk.f32.gmra.mxu0 %vm247_vm4, %v4832_v8  ;;  %4762 = vmatmul.mubr.msk.f32.gmra.mxu1 %vm565_vm5, %v4832_v8 }
  0xb5   :  { %v489_v35 = vpop.permute.xlu1 %488  ;;  %v169_v36 = vpop.permute.xlu0 %168  ;;  %4763 = vmatprep.mubr.msk.f32.mxu1 %vm568_vm6, %v4832_v8 }
  0xb6   :  { %vm250_vm7 = vcmp.eq.s32.totalorder %v5306_v2, %v169_v36  ;;  %vm249_vm8 = vcmp.eq.s32.totalorder %v5297_v63, %v169_v36  ;;  %vm570_vm10 = vcmp.eq.s32.totalorder %v5306_v2, %v489_v35  ;;  %vm569_vm13 = vcmp.eq.s32.totalorder %v5297_v63, %v489_v35 }
  0xb7   :  { %4701 = vmatprep.mubr.msk.f32.mxu0 %vm250_vm7, %v4832_v8 }
  0xb8   :  { %4702 = vmatmul.mubr.msk.f32.gmra.mxu0 %vm249_vm8, %v4832_v8  ;;  %4764 = vmatmul.mubr.msk.f32.gmra.mxu1 %vm567_vm9, %v4832_v8 }
  0xb9   :  { %v492_v37 = vpop.permute.xlu1 %491  ;;  %v172_v38 = vpop.permute.xlu0 %171  ;;  %4765 = vmatprep.mubr.msk.f32.mxu1 %vm570_vm10, %v4832_v8 }
  0xba   :  { %vm251_vm11 = vcmp.eq.s32.totalorder %v5297_v63, %v172_v38  ;;  %vm252_vm12 = vcmp.eq.s32.totalorder %v5306_v2, %v172_v38  ;;  %vm572_vm14 = vcmp.eq.s32.totalorder %v5306_v2, %v492_v37  ;;  %vm571_vm1 = vcmp.eq.s32.totalorder %v5297_v63, %v492_v37 }
  0xbb   :  { %4703 = vmatprep.mubr.msk.f32.mxu0 %vm252_vm12, %v4832_v8 }
  0xbc   :  { %4704 = vmatmul.mubr.msk.f32.gmra.mxu0 %vm251_vm11, %v4832_v8  ;;  %4766 = vmatmul.mubr.msk.f32.gmra.mxu1 %vm569_vm13, %v4832_v8 }
  0xbd   :  { %v495_v39 = vpop.permute.xlu1 %494  ;;  %v175_v40 = vpop.permute.xlu0 %174  ;;  %4767 = vmatprep.mubr.msk.f32.mxu1 %vm572_vm14, %v4832_v8 }
  0xbe   :  { %vm253_vm15 = vcmp.eq.s32.totalorder %v5297_v63, %v175_v40  ;;  %vm254_vm0 = vcmp.eq.s32.totalorder %v5306_v2, %v175_v40  ;;  %vm574_vm2 = vcmp.eq.s32.totalorder %v5306_v2, %v495_v39  ;;  %vm573_vm5 = vcmp.eq.s32.totalorder %v5297_v63, %v495_v39 }
  0xbf   :  { %4705 = vmatprep.mubr.msk.f32.mxu0 %vm254_vm0, %v4832_v8 }
  0xc0   :  { %4706 = vmatmul.mubr.msk.f32.gmra.mxu0 %vm253_vm15, %v4832_v8  ;;  %4768 = vmatmul.mubr.msk.f32.gmra.mxu1 %vm571_vm1, %v4832_v8 }
  0xc1   :  { %v498_v41 = vpop.permute.xlu1 %497  ;;  %v178_v42 = vpop.permute.xlu0 %177  ;;  %4769 = vmatprep.mubr.msk.f32.mxu1 %vm574_vm2, %v4832_v8 }
  0xc2   :  { %vm255_vm3 = vcmp.eq.s32.totalorder %v5297_v63, %v178_v42  ;;  %vm256_vm4 = vcmp.eq.s32.totalorder %v5306_v2, %v178_v42  ;;  %vm576_vm6 = vcmp.eq.s32.totalorder %v5306_v2, %v498_v41  ;;  %vm575_vm9 = vcmp.eq.s32.totalorder %v5297_v63, %v498_v41 }
  0xc3   :  { %4707 = vmatprep.mubr.msk.f32.mxu0 %vm256_vm4, %v4832_v8 }
  0xc4   :  { %4708 = vmatmul.mubr.msk.f32.gmra.mxu0 %vm255_vm3, %v4832_v8  ;;  %4770 = vmatmul.mubr.msk.f32.gmra.mxu1 %vm573_vm5, %v4832_v8 }
  0xc5   :  { %v501_v43 = vpop.permute.xlu1 %500  ;;  %v181_v44 = vpop.permute.xlu0 %180  ;;  %4771 = vmatprep.mubr.msk.f32.mxu1 %vm576_vm6, %v4832_v8 }
  0xc6   :  { %vm257_vm7 = vcmp.eq.s32.totalorder %v5297_v63, %v181_v44  ;;  %vm258_vm8 = vcmp.eq.s32.totalorder %v5306_v2, %v181_v44  ;;  %vm578_vm10 = vcmp.eq.s32.totalorder %v5306_v2, %v501_v43  ;;  %vm577_vm13 = vcmp.eq.s32.totalorder %v5297_v63, %v501_v43 }
  0xc7   :  { %4709 = vmatprep.mubr.msk.f32.mxu0 %vm258_vm8, %v4832_v8 }
  0xc8   :  { %4710 = vmatmul.mubr.msk.f32.gmra.mxu0 %vm257_vm7, %v4832_v8  ;;  %4772 = vmatmul.mubr.msk.f32.gmra.mxu1 %vm575_vm9, %v4832_v8 }
  0xc9   :  { %v504_v45 = vpop.permute.xlu1 %503  ;;  %v184_v46 = vpop.permute.xlu0 %183  ;;  %4773 = vmatprep.mubr.msk.f32.mxu1 %vm578_vm10, %v4832_v8 }
  0xca   :  { %vm259_vm11 = vcmp.eq.s32.totalorder %v5297_v63, %v184_v46  ;;  %vm260_vm12 = vcmp.eq.s32.totalorder %v5306_v2, %v184_v46  ;;  %vm580_vm14 = vcmp.eq.s32.totalorder %v5306_v2, %v504_v45  ;;  %vm579_vm1 = vcmp.eq.s32.totalorder %v5297_v63, %v504_v45 }
  0xcb   :  { %4711 = vmatprep.mubr.msk.f32.mxu0 %vm260_vm12, %v4832_v8 }
  0xcc   :  { %4712 = vmatmul.mubr.msk.f32.gmra.mxu0 %vm259_vm11, %v4832_v8  ;;  %4774 = vmatmul.mubr.msk.f32.gmra.mxu1 %vm577_vm13, %v4832_v8 }
  0xcd   :  { %v507_v47 = vpop.permute.xlu1 %506  ;;  %v187_v48 = vpop.permute.xlu0 %186  ;;  %4775 = vmatprep.mubr.msk.f32.mxu1 %vm580_vm14, %v4832_v8 }
  0xce   :  { %vm261_vm15 = vcmp.eq.s32.totalorder %v5297_v63, %v187_v48  ;;  %vm262_vm0 = vcmp.eq.s32.totalorder %v5306_v2, %v187_v48  ;;  %vm582_vm2 = vcmp.eq.s32.totalorder %v5306_v2, %v507_v47  ;;  %vm581_vm5 = vcmp.eq.s32.totalorder %v5297_v63, %v507_v47 }
  0xcf   :  { %4713 = vmatprep.mubr.msk.f32.mxu0 %vm262_vm0, %v4832_v8 }
  0xd0   :  { %4714 = vmatmul.mubr.msk.f32.gmra.mxu0 %vm261_vm15, %v4832_v8  ;;  %4776 = vmatmul.mubr.msk.f32.gmra.mxu1 %vm579_vm1, %v4832_v8 }
  0xd1   :  { %v510_v49 = vpop.permute.xlu1 %509  ;;  %v190_v50 = vpop.permute.xlu0 %189  ;;  %4777 = vmatprep.mubr.msk.f32.mxu1 %vm582_vm2, %v4832_v8 }
  0xd2   :  { %vm263_vm3 = vcmp.eq.s32.totalorder %v5297_v63, %v190_v50  ;;  %vm264_vm4 = vcmp.eq.s32.totalorder %v5306_v2, %v190_v50  ;;  %vm584_vm6 = vcmp.eq.s32.totalorder %v5306_v2, %v510_v49  ;;  %vm583_vm9 = vcmp.eq.s32.totalorder %v5297_v63, %v510_v49 }
  0xd3   :  { %4715 = vmatprep.mubr.msk.f32.mxu0 %vm264_vm4, %v4832_v8 }
  0xd4   :  { %4716 = vmatmul.mubr.msk.f32.gmra.mxu0 %vm263_vm3, %v4832_v8  ;;  %4778 = vmatmul.mubr.msk.f32.gmra.mxu1 %vm581_vm5, %v4832_v8 }
  0xd5   :  { %v513_v51 = vpop.permute.xlu1 %512  ;;  %v193_v52 = vpop.permute.xlu0 %192  ;;  %4779 = vmatprep.mubr.msk.f32.mxu1 %vm584_vm6, %v4832_v8 }
  0xd6   :  { %vm265_vm7 = vcmp.eq.s32.totalorder %v5297_v63, %v193_v52  ;;  %vm266_vm8 = vcmp.eq.s32.totalorder %v5306_v2, %v193_v52  ;;  %vm586_vm10 = vcmp.eq.s32.totalorder %v5306_v2, %v513_v51  ;;  %vm585_vm13 = vcmp.eq.s32.totalorder %v5297_v63, %v513_v51 }
  0xd7   :  { %4717 = vmatprep.mubr.msk.f32.mxu0 %vm266_vm8, %v4832_v8 }
  0xd8   :  { %4718 = vmatmul.mubr.msk.f32.gmra.mxu0 %vm265_vm7, %v4832_v8  ;;  %4780 = vmatmul.mubr.msk.f32.gmra.mxu1 %vm583_vm9, %v4832_v8 }
  0xd9   :  { %v516_v53 = vpop.permute.xlu1 %515  ;;  %v196_v54 = vpop.permute.xlu0 %195  ;;  %4781 = vmatprep.mubr.msk.f32.mxu1 %vm586_vm10, %v4832_v8 }
  0xda   :  { %vm267_vm11 = vcmp.eq.s32.totalorder %v5297_v63, %v196_v54  ;;  %vm268_vm12 = vcmp.eq.s32.totalorder %v5306_v2, %v196_v54  ;;  %vm588_vm14 = vcmp.eq.s32.totalorder %v5306_v2, %v516_v53  ;;  %vm587_vm1 = vcmp.eq.s32.totalorder %v5297_v63, %v516_v53 }
  0xdb   :  { %4719 = vmatprep.mubr.msk.f32.mxu0 %vm268_vm12, %v4832_v8 }
  0xdc   :  { %4720 = vmatmul.mubr.msk.f32.gmra.mxu0 %vm267_vm11, %v4832_v8  ;;  %4782 = vmatmul.mubr.msk.f32.gmra.mxu1 %vm585_vm13, %v4832_v8 }
  0xdd   :  { %v519_v55 = vpop.permute.xlu1 %518  ;;  %v199_v5 = vpop.permute.xlu0 %198  ;;  %4783 = vmatprep.mubr.msk.f32.mxu1 %vm588_vm14, %v4832_v8 }
  0xde   :  { %vm269_vm15 = vcmp.eq.s32.totalorder %v5297_v63, %v199_v5  ;;  %vm270_vm0 = vcmp.eq.s32.totalorder %v5306_v2, %v199_v5  ;;  %vm590_vm2 = vcmp.eq.s32.totalorder %v5306_v2, %v519_v55  ;;  %vm589_vm5 = vcmp.eq.s32.totalorder %v5297_v63, %v519_v55 }
  0xdf   :  { %4721 = vmatprep.mubr.msk.f32.mxu0 %vm270_vm0, %v4832_v8 }
  0xe0   :  { %4722 = vmatmul.mubr.msk.f32.gmra.mxu0 %vm269_vm15, %v4832_v8  ;;  %4784 = vmatmul.mubr.msk.f32.gmra.mxu1 %vm587_vm1, %v4832_v8 }
  0xe1   :  { %v522_v56 = vpop.permute.xlu1 %521  ;;  %v202_v57 = vpop.permute.xlu0 %201  ;;  %4785 = vmatprep.mubr.msk.f32.mxu1 %vm590_vm2, %v4832_v8 }
  0xe2   :  { %vm271_vm3 = vcmp.eq.s32.totalorder %v5297_v63, %v202_v57  ;;  %vm272_vm4 = vcmp.eq.s32.totalorder %v5306_v2, %v202_v57  ;;  %vm592_vm6 = vcmp.eq.s32.totalorder %v5306_v2, %v522_v56  ;;  %vm591_vm9 = vcmp.eq.s32.totalorder %v5297_v63, %v522_v56 }
  0xe3   :  { %4723 = vmatprep.mubr.msk.f32.mxu0 %vm272_vm4, %v4832_v8 }
  0xe4   :  { %4724 = vmatmul.mubr.msk.f32.gmra.mxu0 %vm271_vm3, %v4832_v8  ;;  %4786 = vmatmul.mubr.msk.f32.gmra.mxu1 %vm589_vm5, %v4832_v8 }
  0xe5   :  { %v525_v58 = vpop.permute.xlu1 %524  ;;  %v205_v59 = vpop.permute.xlu0 %204  ;;  %4787 = vmatprep.mubr.msk.f32.mxu1 %vm592_vm6, %v4832_v8 }
  0xe6   :  { %vm273_vm7 = vcmp.eq.s32.totalorder %v5297_v63, %v205_v59  ;;  %vm274_vm8 = vcmp.eq.s32.totalorder %v5306_v2, %v205_v59  ;;  %vm594_vm10 = vcmp.eq.s32.totalorder %v5306_v2, %v525_v58  ;;  %vm593_vm13 = vcmp.eq.s32.totalorder %v5297_v63, %v525_v58 }
  0xe7   :  { %4725 = vmatprep.mubr.msk.f32.mxu0 %vm274_vm8, %v4832_v8 }
  0xe8   :  { %4726 = vmatmul.mubr.msk.f32.gmra.mxu0 %vm273_vm7, %v4832_v8  ;;  %4788 = vmatmul.mubr.msk.f32.gmra.mxu1 %vm591_vm9, %v4832_v8 }
  0xe9   :  { %v528_v61 = vpop.permute.xlu1 %527  ;;  %v208_v62 = vpop.permute.xlu0 %207  ;;  %4789 = vmatprep.mubr.msk.f32.mxu1 %vm594_vm10, %v4832_v8 }
  0xea   :  { %vm275_vm11 = vcmp.eq.s32.totalorder %v5297_v63, %v208_v62  ;;  %vm276_vm12 = vcmp.eq.s32.totalorder %v5306_v2, %v208_v62  ;;  %vm596_vm14 = vcmp.eq.s32.totalorder %v5306_v2, %v528_v61  ;;  %vm595_vm1 = vcmp.eq.s32.totalorder %v5297_v63, %v528_v61 }
  0xeb   :  { %4727 = vmatprep.mubr.msk.f32.mxu0 %vm276_vm12, %v4832_v8 }
  0xec   :  { %4728 = vmatmul.mubr.msk.f32.gmra.mxu0 %vm275_vm11, %v4832_v8  ;;  %4790 = vmatmul.mubr.msk.f32.gmra.mxu1 %vm593_vm13, %v4832_v8 }
  0xed   :  { %v531_v0 = vpop.permute.xlu1 %530  ;;  %v211_v1 = vpop.permute.xlu0 %210  ;;  %4791 = vmatprep.mubr.msk.f32.mxu1 %vm596_vm14, %v4832_v8 }
  0xee   :  { %vm277_vm15 = vcmp.eq.s32.totalorder %v5297_v63, %v211_v1  ;;  %vm278_vm0 = vcmp.eq.s32.totalorder %v5306_v2, %v211_v1  ;;  %vm598_vm2 = vcmp.eq.s32.totalorder %v5306_v2, %v531_v0  ;;  %vm597_vm5 = vcmp.eq.s32.totalorder %v5297_v63, %v531_v0 }
  0xef   :  { %4729 = vmatprep.mubr.msk.f32.mxu0 %vm278_vm0, %v4832_v8  ;;  %vm4331_vm0 = vcmask 130112  }
  0xf0   :  { %4730 = vmatmul.mubr.msk.f32.gmra.mxu0 %vm277_vm15, %v4832_v8  ;;  %4792 = vmatmul.mubr.msk.f32.gmra.mxu1 %vm595_vm1, %v4832_v8  ;;  %vm4338_vm1 = vcmask 195712  }
  0xf1   :  { %v534_v3 = vpop.permute.xlu1 %533  ;;  %v214_v4 = vpop.permute.xlu0 %213  ;;  %4793 = vmatprep.mubr.msk.f32.mxu1 %vm598_vm2, %v4832_v8  ;;  %vm4345_vm2 = vcmask 261312  }
  0xf2   :  { %vm279_vm3 = vcmp.eq.s32.totalorder %v5297_v63, %v214_v4  ;;  %vm280_vm4 = vcmp.eq.s32.totalorder %v5306_v2, %v214_v4  ;;  %vm600_vm6 = vcmp.eq.s32.totalorder %v5306_v2, %v534_v3  ;;  %vm599_vm9 = vcmp.eq.s32.totalorder %v5297_v63, %v534_v3 }
  0xf3   :  { %4731 = vmatprep.mubr.msk.f32.mxu0 %vm280_vm4, %v4832_v8  ;;  %vm4359_vm4 = vcmask 392512  }
  0xf4   :  { %4732 = vmatmul.mubr.msk.f32.gmra.mxu0 %vm279_vm3, %v4832_v8  ;;  %4794 = vmatmul.mubr.msk.f32.gmra.mxu1 %vm597_vm5, %v4832_v8  ;;  %vm4352_vm3 = vcmask 326912   ;;  %vm4366_vm5 = vcmask 458112  }
  0xf5   :  { %v537_v6 = vpop.permute.xlu1 %536  ;;  %v217_v7 = vpop.permute.xlu0 %216  ;;  %4795 = vmatprep.mubr.msk.f32.mxu1 %vm600_vm6, %v4832_v8  ;;  %vm4373_vm6 = vcmask 523712  }
  0xf6   :  { %vm281_vm7 = vcmp.eq.s32.totalorder %v5297_v63, %v217_v7  ;;  %vm282_vm8 = vcmp.eq.s32.totalorder %v5306_v2, %v217_v7  ;;  %vm602_vm10 = vcmp.eq.s32.totalorder %v5306_v2, %v537_v6  ;;  %vm601_vm13 = vcmp.eq.s32.totalorder %v5297_v63, %v537_v6 }
  0xf7   :  { %4733 = vmatprep.mubr.msk.f32.mxu0 %vm282_vm8, %v4832_v8  ;;  %vm4387_vm8 = vcmask 654912  }
  0xf8   :  { %4734 = vmatmul.mubr.msk.f32.gmra.mxu0 %vm281_vm7, %v4832_v8  ;;  %4796 = vmatmul.mubr.msk.f32.gmra.mxu1 %vm599_vm9, %v4832_v8  ;;  %vm4380_vm7 = vcmask 589312   ;;  %vm4394_vm9 = vcmask 720512  }
  0xf9   :  { %v540_v9 = vpop.permute.xlu1 %539  ;;  %v220_v10 = vpop.permute.xlu0 %219  ;;  %4797 = vmatprep.mubr.msk.f32.mxu1 %vm602_vm10, %v4832_v8  ;;  %vm4401_vm10 = vcmask 786112  }
  0xfa   :  { %vm283_vm11 = vcmp.eq.s32.totalorder %v5297_v63, %v220_v10  ;;  %vm284_vm12 = vcmp.eq.s32.totalorder %v5306_v2, %v220_v10  ;;  %vm604_vm14 = vcmp.eq.s32.totalorder %v5306_v2, %v540_v9  ;;  %vm603_vm15 = vcmp.eq.s32.totalorder %v5297_v63, %v540_v9 }
  0xfb   :  { %4735 = vmatprep.mubr.msk.f32.mxu0 %vm284_vm12, %v4832_v8  ;;  %vm4415_vm12 = vcmask 917312  }
  0xfc   :  { %4736 = vmatmul.mubr.msk.f32.gmra.mxu0 %vm283_vm11, %v4832_v8  ;;  %4798 = vmatmul.mubr.msk.f32.gmra.mxu1 %vm601_vm13, %v4832_v8  ;;  %vm4408_vm11 = vcmask 851712   ;;  %vm4422_vm13 = vcmask 982912  }
  0xfd   :  { %4799 = vmatprep.mubr.msk.f32.mxu1 %vm604_vm14, %v4832_v8  ;;  %vm4429_vm14 = vcmask 1048512  }
 0x100   :  { %4800 = vmatmul.mubr.msk.f32.gmra.mxu1 %vm603_vm15, %v4832_v8  ;;  %vm4528_vm15 = vcmp.lt.s32.totalorder %v86_v60, 256 }
 0x140   :  { %v863_v11 = vpop.f32.mrf.mxu0 }
 0x142   :  { %v865_v12 = vpop.f32.mrf.mxu0 }
 0x144   :  { %v868_v13 = vpop.f32.mrf.mxu0  ;;  %v1216_v14 = vpop.f32.mrf.mxu1 }
 0x145   :  { %v1506_v15 = vmul.f32 %v1216_v14, %v863_v11 }
 0x146   :  { %v870_v16 = vpop.f32.mrf.mxu0  ;;  %v1218_v17 = vpop.f32.mrf.mxu1 }
 0x147   :  { %1538 = vadd.xlane.f32.xlu0 %v1506_v15 }
 0x148   :  { %v873_v18 = vpop.f32.mrf.mxu0  ;;  %v1221_v2 = vpop.f32.mrf.mxu1 }
 0x149   :  { %v1507_v19 = vmul.f32 %v1221_v2, %v868_v13 }
 0x14a   :  { %v875_v20 = vpop.f32.mrf.mxu0  ;;  %v1223_v21 = vpop.f32.mrf.mxu1 }
 0x14b   :  { %1540 = vadd.xlane.f32.xlu1 %v1507_v19 }
 0x14c   :  { %v878_v22 = vpop.f32.mrf.mxu0  ;;  %v1226_v23 = vpop.f32.mrf.mxu1 }
 0x14d   :  { %v1508_v24 = vmul.f32 %v1226_v23, %v873_v18 }
 0x14e   :  { %v880_v25 = vpop.f32.mrf.mxu0  ;;  %v1228_v26 = vpop.f32.mrf.mxu1 }
 0x14f   :  { %1542 = vadd.xlane.f32.xlu0 %v1508_v24 }
 0x150   :  { %v883_v8 = vpop.f32.mrf.mxu0  ;;  %v1231_v27 = vpop.f32.mrf.mxu1 }
 0x151   :  { %v1509_v28 = vmul.f32 %v1231_v27, %v878_v22 }
 0x152   :  { %v885_v29 = vpop.f32.mrf.mxu0  ;;  %v1233_v30 = vpop.f32.mrf.mxu1 }
 0x153   :  { %1544 = vadd.xlane.f32.xlu0 %v1509_v28 }
 0x154   :  { %v888_v31 = vpop.f32.mrf.mxu0  ;;  %v1236_v32 = vpop.f32.mrf.mxu1 }
 0x155   :  { %v1510_v33 = vmul.f32 %v1236_v32, %v883_v8 }
 0x156   :  { %v890_v34 = vpop.f32.mrf.mxu0  ;;  %v1238_v35 = vpop.f32.mrf.mxu1 }
 0x157   :  { %1546 = vadd.xlane.f32.xlu1 %v1510_v33 }
 0x158   :  { %v893_v36 = vpop.f32.mrf.mxu0  ;;  %v1241_v37 = vpop.f32.mrf.mxu1 }
 0x159   :  { %v1511_v38 = vmul.f32 %v1241_v37, %v888_v31 }
 0x15a   :  { %v895_v39 = vpop.f32.mrf.mxu0  ;;  %v1243_v40 = vpop.f32.mrf.mxu1 }
 0x15b   :  { %1548 = vadd.xlane.f32.xlu0 %v1511_v38 }
 0x15c   :  { %v898_v41 = vpop.f32.mrf.mxu0  ;;  %v1246_v42 = vpop.f32.mrf.mxu1 }
 0x15d   :  { %v1512_v43 = vmul.f32 %v1246_v42, %v893_v36 }
 0x15e   :  { %v900_v44 = vpop.f32.mrf.mxu0  ;;  %v1248_v45 = vpop.f32.mrf.mxu1 }
 0x15f   :  { %1550 = vadd.xlane.f32.xlu1 %v1512_v43 }
 0x160   :  { %v903_v46 = vpop.f32.mrf.mxu0  ;;  %v1251_v47 = vpop.f32.mrf.mxu1 }
 0x161   :  { %v1513_v48 = vmul.f32 %v1251_v47, %v898_v41 }
 0x162   :  { %v905_v49 = vpop.f32.mrf.mxu0  ;;  %v1253_v50 = vpop.f32.mrf.mxu1 }
 0x163   :  { %1552 = vadd.xlane.f32.xlu0 %v1513_v48 }
 0x164   :  { %v908_v51 = vpop.f32.mrf.mxu0  ;;  %v1256_v52 = vpop.f32.mrf.mxu1 }
 0x165   :  { %v1514_v53 = vmul.f32 %v1256_v52, %v903_v46 }
 0x166   :  { %v910_v54 = vpop.f32.mrf.mxu0  ;;  %v1258_v55 = vpop.f32.mrf.mxu1 }
 0x167   :  { %1554 = vadd.xlane.f32.xlu1 %v1514_v53 }
 0x168   :  { %v913_v5 = vpop.f32.mrf.mxu0  ;;  %v1261_v56 = vpop.f32.mrf.mxu1 }
 0x169   :  { %v1515_v57 = vmul.f32 %v1261_v56, %v908_v51 }
 0x16a   :  { %v915_v58 = vpop.f32.mrf.mxu0  ;;  %v1263_v59 = vpop.f32.mrf.mxu1 }
 0x16b   :  { %1556 = vadd.xlane.f32.xlu0 %v1515_v57 }
 0x16c   :  { %v918_v61 = vpop.f32.mrf.mxu0  ;;  %v1266_v62 = vpop.f32.mrf.mxu1 }
 0x16d   :  { %v1516_v0 = vmul.f32 %v1266_v62, %v913_v5 }
 0x16e   :  { %v920_v1 = vpop.f32.mrf.mxu0  ;;  %v1268_v3 = vpop.f32.mrf.mxu1 }
 0x16f   :  { %1558 = vadd.xlane.f32.xlu1 %v1516_v0 }
 0x170   :  { %v923_v4 = vpop.f32.mrf.mxu0  ;;  %v1271_v6 = vpop.f32.mrf.mxu1 }
 0x171   :  { %v1517_v7 = vmul.f32 %v1271_v6, %v918_v61 }
 0x172   :  { %v925_v9 = vpop.f32.mrf.mxu0  ;;  %v1273_v10 = vpop.f32.mrf.mxu1 }
 0x173   :  { %1560 = vadd.xlane.f32.xlu0 %v1517_v7 }
 0x174   :  { %v928_v11 = vpop.f32.mrf.mxu0  ;;  %v1276_v12 = vpop.f32.mrf.mxu1 }
 0x175   :  { %v1518_v13 = vmul.f32 %v1276_v12, %v923_v4 }
 0x176   :  { %v930_v14 = vpop.f32.mrf.mxu0  ;;  %v1278_v15 = vpop.f32.mrf.mxu1 }
 0x177   :  { %1562 = vadd.xlane.f32.xlu1 %v1518_v13 }
 0x178   :  { %v933_v16 = vpop.f32.mrf.mxu0  ;;  %v1281_v17 = vpop.f32.mrf.mxu1 }
 0x179   :  { %v1519_v18 = vmul.f32 %v1281_v17, %v928_v11 }
 0x17a   :  { %v935_v2 = vpop.f32.mrf.mxu0  ;;  %v1283_v19 = vpop.f32.mrf.mxu1 }
 0x17b   :  { %1564 = vadd.xlane.f32.xlu0 %v1519_v18 }
 0x17c   :  { %v938_v20 = vpop.f32.mrf.mxu0  ;;  %v1286_v21 = vpop.f32.mrf.mxu1 }
 0x17d   :  { %v1520_v22 = vmul.f32 %v1286_v21, %v933_v16 }
 0x17e   :  { %v940_v23 = vpop.f32.mrf.mxu0  ;;  %v1288_v24 = vpop.f32.mrf.mxu1 }
 0x17f   :  { %1566 = vadd.xlane.f32.xlu1 %v1520_v22 }
 0x180   :  { %v943_v25 = vpop.f32.mrf.mxu0  ;;  %v1291_v26 = vpop.f32.mrf.mxu1 }
 0x181   :  { %v1521_v8 = vmul.f32 %v1291_v26, %v938_v20 }
 0x182   :  { %v945_v27 = vpop.f32.mrf.mxu0  ;;  %v1293_v28 = vpop.f32.mrf.mxu1 }
 0x183   :  { %1568 = vadd.xlane.f32.xlu0 %v1521_v8 }
 0x184   :  { %v948_v29 = vpop.f32.mrf.mxu0  ;;  %v1296_v30 = vpop.f32.mrf.mxu1 }
 0x185   :  { %v1522_v31 = vmul.f32 %v1296_v30, %v943_v25 }
 0x186   :  { %v950_v32 = vpop.f32.mrf.mxu0  ;;  %v1298_v33 = vpop.f32.mrf.mxu1 }
 0x187   :  { %1570 = vadd.xlane.f32.xlu1 %v1522_v31 }
 0x188   :  { %v953_v34 = vpop.f32.mrf.mxu0  ;;  %v1301_v35 = vpop.f32.mrf.mxu1 }
 0x189   :  { %v1523_v36 = vmul.f32 %v1301_v35, %v948_v29 }
 0x18a   :  { %v955_v37 = vpop.f32.mrf.mxu0  ;;  %v1303_v38 = vpop.f32.mrf.mxu1 }
 0x18b   :  { %1572 = vadd.xlane.f32.xlu0 %v1523_v36 }
 0x18c   :  { %v958_v39 = vpop.f32.mrf.mxu0  ;;  %v1306_v40 = vpop.f32.mrf.mxu1 }
 0x18d   :  { %v1524_v41 = vmul.f32 %v1306_v40, %v953_v34 }
 0x18e   :  { %v960_v42 = vpop.f32.mrf.mxu0  ;;  %v1308_v43 = vpop.f32.mrf.mxu1 }
 0x18f   :  { %1574 = vadd.xlane.f32.xlu1 %v1524_v41 }
 0x190   :  { %v963_v44 = vpop.f32.mrf.mxu0  ;;  %v1311_v45 = vpop.f32.mrf.mxu1 }
 0x191   :  { %v1525_v46 = vmul.f32 %v1311_v45, %v958_v39  ;;  %v4833_v45 = vmov 1966171168  }
 0x192   :  { %v965_v47 = vpop.f32.mrf.mxu0  ;;  %v1313_v48 = vpop.f32.mrf.mxu1 }
 0x193   :  { %1576 = vadd.xlane.f32.xlu0 %v1525_v46  ;;  %v2663_v46 = vunpack.c.l.s4 %v4833_v45  ;;  %v5571_v47 = vshrl.u32 %v86_v60, 7 }
 0x194   :  { %v968_v49 = vpop.f32.mrf.mxu0  ;;  %v1316_v50 = vpop.f32.mrf.mxu1 }
 0x195   :  { %v1526_v51 = vmul.f32 %v1316_v50, %v963_v44  ;;  %v2664_v48 = vunpack.c.0.s8 %v2663_v46  ;;  %v5577_v50 = vsub.s32 1, %v5571_v47 }
 0x196   :  { %v970_v52 = vpop.f32.mrf.mxu0  ;;  %v1318_v53 = vpop.f32.mrf.mxu1 }
 0x197   :  { %1578 = vadd.xlane.f32.xlu1 %v1526_v51  ;;  %v5580_v51 = vsub.s32 2, %v5571_v47  ;;  %v5583_v52 = vsub.s32 3, %v5571_v47  ;;  %v5586_v53 = vsub.s32 4, %v5571_v47 }
 0x198   :  { %v973_v54 = vpop.f32.mrf.mxu0  ;;  %v1321_v55 = vpop.f32.mrf.mxu1 }
 0x199   :  { %v1527_v5 = vmul.f32 %v1321_v55, %v968_v49  ;;  %v5574_v49 = vsub.s32 0, %v5571_v47  ;;  %v5592_v55 = vsub.s32 6, %v5571_v47 }
 0x19a   :  { %v975_v56 = vpop.f32.mrf.mxu0  ;;  %v1323_v57 = vpop.f32.mrf.mxu1 }
 0x19b   :  { %1580 = vadd.xlane.f32.xlu0 %v1527_v5  ;;  %v5595_v5 = vsub.s32 7, %v5571_v47  ;;  %v5598_v57 = vsub.s32 %v2664_v48, %v5571_v47 }
 0x19c   :  { %v978_v58 = vpop.f32.mrf.mxu0  ;;  %v1326_v59 = vpop.f32.mrf.mxu1 }
 0x19d   :  { %v1528_v61 = vmul.f32 %v1326_v59, %v973_v54  ;;  %v5589_v54 = vsub.s32 5, %v5571_v47 }
 0x19e   :  { %v980_v62 = vpop.f32.mrf.mxu0  ;;  %v1328_v0 = vpop.f32.mrf.mxu1 }
 0x19f   :  { %1582 = vadd.xlane.f32.xlu1 %v1528_v61 }
 0x1a0   :  { %v983_v1 = vpop.f32.mrf.mxu0  ;;  %v1331_v3 = vpop.f32.mrf.mxu1 }
 0x1a1   :  { %v1529_v4 = vmul.f32 %v1331_v3, %v978_v58 }
 0x1a2   :  { %v985_v6 = vpop.f32.mrf.mxu0  ;;  %v1333_v7 = vpop.f32.mrf.mxu1 }
 0x1a3   :  { %1584 = vadd.xlane.f32.xlu0 %v1529_v4 }
 0x1a4   :  { %v988_v9 = vpop.f32.mrf.mxu0  ;;  %v1336_v10 = vpop.f32.mrf.mxu1 }
 0x1a5   :  { %v1530_v11 = vmul.f32 %v1336_v10, %v983_v1 }
 0x1a6   :  { %v990_v12 = vpop.f32.mrf.mxu0  ;;  %v1338_v13 = vpop.f32.mrf.mxu1 }
 0x1a7   :  { %1586 = vadd.xlane.f32.xlu1 %v1530_v11 }
 0x1a8   :  { %v993_v14 = vpop.f32.mrf.mxu0  ;;  %v1341_v15 = vpop.f32.mrf.mxu1 }
 0x1a9   :  { %v1531_v16 = vmul.f32 %v1341_v15, %v988_v9 }
 0x1aa   :  { %v995_v17 = vpop.f32.mrf.mxu0  ;;  %v1343_v18 = vpop.f32.mrf.mxu1 }
 0x1ab   :  { %1588 = vadd.xlane.f32.xlu0 %v1531_v16 }
 0x1ac   :  { %v998_v2 = vpop.f32.mrf.mxu0  ;;  %v1346_v19 = vpop.f32.mrf.mxu1 }
 0x1ad   :  { %v1532_v20 = vmul.f32 %v1346_v19, %v993_v14 }
 0x1ae   :  { %v1000_v21 = vpop.f32.mrf.mxu0  ;;  %v1348_v22 = vpop.f32.mrf.mxu1 }
 0x1af   :  { %1590 = vadd.xlane.f32.xlu1 %v1532_v20 }
 0x1b0   :  { %v1003_v23 = vpop.f32.mrf.mxu0  ;;  %v1351_v24 = vpop.f32.mrf.mxu1 }
 0x1b1   :  { %v1533_v25 = vmul.f32 %v1351_v24, %v998_v2 }
 0x1b2   :  { %v1005_v26 = vpop.f32.mrf.mxu0  ;;  %v1353_v8 = vpop.f32.mrf.mxu1 }
 0x1b3   :  { %1592 = vadd.xlane.f32.xlu0 %v1533_v25 }
 0x1b4   :  { %v1008_v27 = vpop.f32.mrf.mxu0  ;;  %v1356_v28 = vpop.f32.mrf.mxu1 }
 0x1b5   :  { %v1534_v29 = vmul.f32 %v1356_v28, %v1003_v23 }
 0x1b6   :  { %v1010_v30 = vpop.f32.mrf.mxu0  ;;  %v1358_v31 = vpop.f32.mrf.mxu1 }
 0x1b7   :  { %1594 = vadd.xlane.f32.xlu1 %v1534_v29 }
 0x1b8   :  { %v1013_v32 = vpop.f32.mrf.mxu0  ;;  %v1361_v33 = vpop.f32.mrf.mxu1 }
 0x1b9   :  { %v1535_v34 = vmul.f32 %v1361_v33, %v1008_v27 }
 0x1ba   :  { %v1015_v35 = vpop.f32.mrf.mxu0  ;;  %v1363_v36 = vpop.f32.mrf.mxu1 }
 0x1bb   :  { %1596 = vadd.xlane.f32.xlu0 %v1535_v34 }
 0x1bc   :  { %v1018_v37 = vpop.f32.mrf.mxu0  ;;  %v1366_v38 = vpop.f32.mrf.mxu1 }
 0x1bd   :  { %v1536_v39 = vmul.f32 %v1366_v38, %v1013_v32 }
 0x1be   :  { %v1020_v40 = vpop.f32.mrf.mxu0  ;;  %v1368_v41 = vpop.f32.mrf.mxu1 }
 0x1bf   :  { %1598 = vadd.xlane.f32.xlu1 %v1536_v39 }
 0x1c0   :  { %v1371_v42 = vpop.f32.mrf.mxu1 }
 0x1c1   :  { %v1537_v43 = vmul.f32 %v1371_v42, %v1018_v37 }
 0x1c2   :  { %v1373_v44 = vpop.f32.mrf.mxu1 }
 0x1c3   :  { %1600 = vadd.xlane.f32.xlu0 %v1537_v43 }
 0x1d0   :  { %v1539_v56 = vpop.xlane.xlu0 %1538 }
 0x1d1   :  { %v1637_v58 = vrot.slane %v1539_v56, %v5574_v49  ;;  %v1641_v59 = vrot.slane %v1539_v56, %v5577_v50  ;;  %v1645_v61 = vrot.slane %v1539_v56, %v5580_v51  ;;  %v1649_v62 = vrot.slane %v1539_v56, %v5583_v52 }
 0x1d2   :  { %v1653_v0 = vrot.slane %v1539_v56, %v5586_v53  ;;  %v1657_v1 = vrot.slane %v1539_v56, %v5589_v54  ;;  %v1661_v3 = vrot.slane %v1539_v56, %v5592_v55  ;;  %v1665_v4 = vrot.slane %v1539_v56, %v5595_v5 }
 0x1d3   :  { %v2658_v6 = vcombine.low %v1637_v58, %v1641_v59  ;;  %v2659_v7 = vcombine.low %v1645_v61, %v1649_v62 }
 0x1d4   :  { %v1541_v9 = vpop.xlane.xlu1 %1540  ;;  %v2660_v10 = vcombine.low %v1653_v0, %v1657_v1  ;;  %v2661_v11 = vcombine.low %v1661_v3, %v1665_v4 }
 0x1d5   :  { %v2668_v12 = vrot.slane %v2658_v6, %v5598_v57  ;;  %v2675_v13 = vrot.slane %v2659_v7, %v5598_v57  ;;  %v1669_v14 = vrot.slane %v1541_v9, %v5574_v49  ;;  %v1673_v15 = vrot.slane %v1541_v9, %v5577_v50 }
 0x1d6   :  { %v2682_v16 = vrot.slane %v2660_v10, %v5598_v57  ;;  %v2689_v17 = vrot.slane %v2661_v11, %v5598_v57  ;;  %v1677_v18 = vrot.slane %v1541_v9, %v5580_v51  ;;  %v1681_v2 = vrot.slane %v1541_v9, %v5583_v52 }
 0x1d7   :  { %v2690_v19 = vcombine.low %v2668_v12, %v2675_v13  ;;  %v1685_v20 = vrot.slane %v1541_v9, %v5586_v53  ;;  %v1689_v21 = vrot.slane %v1541_v9, %v5589_v54  ;;  %v1693_v22 = vrot.slane %v1541_v9, %v5592_v55 }
 0x1d8   :  { %v1543_v23 = vpop.xlane.xlu0 %1542  ;;  %v2691_v24 = vcombine.low %v2682_v16, %v2689_v17  ;;  %v1697_v25 = vrot.slane %v1541_v9, %v5595_v5  ;;  %v2707_v26 = vcombine.low %v1669_v14, %v1673_v15  ;;  %v2708_v8 = vcombine.low %v1677_v18, %v1681_v2 }
 0x1d9   :  { %v2698_v27 = vrot.slane %v2690_v19, %v5598_v57  ;;  %v2709_v28 = vcombine.low %v1685_v20, %v1689_v21  ;;  %v1701_v29 = vrot.slane %v1543_v23, %v5574_v49  ;;  %v1705_v30 = vrot.slane %v1543_v23, %v5577_v50 }
 0x1da   :  { %v2705_v31 = vrot.slane %v2691_v24, %v5598_v57  ;;  %v2710_v32 = vcombine.low %v1693_v22, %v1697_v25  ;;  %v2717_v33 = vrot.slane %v2707_v26, %v5598_v57  ;;  %v2724_v34 = vrot.slane %v2708_v8, %v5598_v57 }
 0x1db   :  { %v2731_v35 = vrot.slane %v2709_v28, %v5598_v57  ;;  %v1709_v36 = vrot.slane %v1543_v23, %v5580_v51  ;;  %v1713_v37 = vrot.slane %v1543_v23, %v5583_v52  ;;  %v1717_v38 = vrot.slane %v1543_v23, %v5586_v53 }
 0x1dc   :  { %v1545_v39 = vpop.xlane.xlu0 %1544  ;;  %v2706_v40 = vcombine.low %v2698_v27, %v2705_v31  ;;  %v2738_v41 = vrot.slane %v2710_v32, %v5598_v57  ;;  %v2739_v42 = vcombine.low %v2717_v33, %v2724_v34  ;;  %v1721_v43 = vrot.slane %v1543_v23, %v5589_v54 }
 0x1dd   :  { %v1725_v44 = vrot.slane %v1543_v23, %v5592_v55  ;;  %v1729_v45 = vrot.slane %v1543_v23, %v5595_v5  ;;  %v2756_v46 = vcombine.low %v1701_v29, %v1705_v30  ;;  %v2757_v48 = vcombine.low %v1709_v36, %v1713_v37 }
 0x1de   :  { %4227 = vperm.xlu1 %4807, %v2706_v40   ;;  %v2740_v56 = vcombine.low %v2731_v35, %v2738_v41  ;;  %v2747_v58 = vrot.slane %v2739_v42, %v5598_v57  ;;  %v2758_v59 = vcombine.low %v1717_v38, %v1721_v43  ;;  %v1733_v61 = vrot.slane %v1545_v39, %v5574_v49 }
 0x1df   :  { %v2759_v62 = vcombine.low %v1725_v44, %v1729_v45  ;;  %v2766_v0 = vrot.slane %v2756_v46, %v5598_v57  ;;  %v2773_v1 = vrot.slane %v2757_v48, %v5598_v57  ;;  %v1737_v3 = vrot.slane %v1545_v39, %v5577_v50 }
 0x1e0   :  { %v2754_v4 = vrot.slane %v2740_v56, %v5598_v57  ;;  %v2780_v6 = vrot.slane %v2758_v59, %v5598_v57  ;;  %v1741_v7 = vrot.slane %v1545_v39, %v5580_v51  ;;  %v1745_v9 = vrot.slane %v1545_v39, %v5583_v52  ;;  %v1547_v10 = vpop.xlane.xlu1 %1546 }
 0x1e1   :  { %v2787_v11 = vrot.slane %v2759_v62, %v5598_v57  ;;  %v2788_v12 = vcombine.low %v2766_v0, %v2773_v1  ;;  %v1749_v13 = vrot.slane %v1545_v39, %v5586_v53  ;;  %v1753_v14 = vrot.slane %v1545_v39, %v5589_v54 }
 0x1e2   :  { %v2755_v15 = vcombine.low %v2747_v58, %v2754_v4  ;;  %v1757_v16 = vrot.slane %v1545_v39, %v5592_v55  ;;  %v1761_v17 = vrot.slane %v1545_v39, %v5595_v5  ;;  %v2805_v18 = vcombine.low %v1733_v61, %v1737_v3 }
 0x1e3   :  { %v2789_v2 = vcombine.low %v2780_v6, %v2787_v11  ;;  %v2796_v19 = vrot.slane %v2788_v12, %v5598_v57  ;;  %v2806_v20 = vcombine.low %v1741_v7, %v1745_v9  ;;  %v2807_v21 = vcombine.low %v1749_v13, %v1753_v14 }
 0x1e4   :  { %4230 = vperm.xlu0 %4806, %v2755_v15   ;;  %v2808_v22 = vcombine.low %v1757_v16, %v1761_v17  ;;  %v2815_v23 = vrot.slane %v2805_v18, %v5598_v57  ;;  %v1765_v24 = vrot.slane %v1547_v10, %v5574_v49  ;;  %v1769_v25 = vrot.slane %v1547_v10, %v5577_v50  ;;  %v1549_v29 = vpop.xlane.xlu0 %1548 }
 0x1e5   :  { %v2803_v26 = vrot.slane %v2789_v2, %v5598_v57  ;;  %v2822_v8 = vrot.slane %v2806_v20, %v5598_v57  ;;  %v2829_v27 = vrot.slane %v2807_v21, %v5598_v57  ;;  %v1773_v28 = vrot.slane %v1547_v10, %v5580_v51 }
 0x1e6   :  { %v2836_v30 = vrot.slane %v2808_v22, %v5598_v57  ;;  %v1777_v31 = vrot.slane %v1547_v10, %v5583_v52  ;;  %v1781_v32 = vrot.slane %v1547_v10, %v5586_v53  ;;  %v1785_v33 = vrot.slane %v1547_v10, %v5589_v54 }
 0x1e7   :  { %v2804_v34 = vcombine.low %v2796_v19, %v2803_v26  ;;  %v2837_v35 = vcombine.low %v2815_v23, %v2822_v8  ;;  %v1789_v36 = vrot.slane %v1547_v10, %v5592_v55  ;;  %v1793_v37 = vrot.slane %v1547_v10, %v5595_v5 }
 0x1e8   :  { %v2838_v38 = vcombine.low %v2829_v27, %v2836_v30  ;;  %v2854_v39 = vcombine.low %v1765_v24, %v1769_v25  ;;  %v2855_v40 = vcombine.low %v1773_v28, %v1777_v31  ;;  %v2856_v41 = vcombine.low %v1781_v32, %v1785_v33  ;;  %v1551_v59 = vpop.xlane.xlu1 %1550 }
 0x1e9   :  { %4233 = vperm.xlu1 %4807, %v2804_v34   ;;  %v2845_v42 = vrot.slane %v2837_v35, %v5598_v57  ;;  %v2857_v43 = vcombine.low %v1789_v36, %v1793_v37  ;;  %v1797_v44 = vrot.slane %v1549_v29, %v5574_v49  ;;  %v1801_v45 = vrot.slane %v1549_v29, %v5577_v50 }
 0x1ea   :  { %v2852_v46 = vrot.slane %v2838_v38, %v5598_v57  ;;  %v2864_v48 = vrot.slane %v2854_v39, %v5598_v57  ;;  %v2871_v56 = vrot.slane %v2855_v40, %v5598_v57  ;;  %v2878_v58 = vrot.slane %v2856_v41, %v5598_v57 }
 0x1eb   :  { %v2885_v61 = vrot.slane %v2857_v43, %v5598_v57  ;;  %v1805_v62 = vrot.slane %v1549_v29, %v5580_v51  ;;  %v1809_v0 = vrot.slane %v1549_v29, %v5583_v52  ;;  %v1813_v1 = vrot.slane %v1549_v29, %v5586_v53 }
 0x1ec   :  { %v2853_v3 = vcombine.low %v2845_v42, %v2852_v46  ;;  %v2886_v4 = vcombine.low %v2864_v48, %v2871_v56  ;;  %v1817_v6 = vrot.slane %v1549_v29, %v5589_v54  ;;  %v1821_v7 = vrot.slane %v1549_v29, %v5592_v55  ;;  %v1553_v20 = vpop.xlane.xlu0 %1552 }
 0x1ed   :  { %v2887_v9 = vcombine.low %v2878_v58, %v2885_v61  ;;  %v1825_v10 = vrot.slane %v1549_v29, %v5595_v5  ;;  %v2903_v11 = vcombine.low %v1797_v44, %v1801_v45  ;;  %v2904_v12 = vcombine.low %v1805_v62, %v1809_v0 }
 0x1ee   :  { %4236 = vperm.xlu1 %4807, %v2853_v3   ;;  %v2894_v13 = vrot.slane %v2886_v4, %v5598_v57  ;;  %v2905_v14 = vcombine.low %v1813_v1, %v1817_v6  ;;  %v1829_v15 = vrot.slane %v1551_v59, %v5574_v49  ;;  %v1833_v16 = vrot.slane %v1551_v59, %v5577_v50 }
 0x1ef   :  { %v2901_v17 = vrot.slane %v2887_v9, %v5598_v57  ;;  %v2906_v18 = vcombine.low %v1821_v7, %v1825_v10  ;;  %v2913_v2 = vrot.slane %v2903_v11, %v5598_v57  ;;  %v2920_v19 = vrot.slane %v2904_v12, %v5598_v57 }
 0x1f0   :  { %v2927_v21 = vrot.slane %v2905_v14, %v5598_v57  ;;  %v1837_v22 = vrot.slane %v1551_v59, %v5580_v51  ;;  %v1841_v23 = vrot.slane %v1551_v59, %v5583_v52  ;;  %v1845_v24 = vrot.slane %v1551_v59, %v5586_v53  ;;  %v1555_v44 = vpop.xlane.xlu1 %1554 }
 0x1f1   :  { %v2902_v25 = vcombine.low %v2894_v13, %v2901_v17  ;;  %v2934_v26 = vrot.slane %v2906_v18, %v5598_v57  ;;  %v2935_v8 = vcombine.low %v2913_v2, %v2920_v19  ;;  %v1849_v27 = vrot.slane %v1551_v59, %v5589_v54 }
 0x1f2   :  { %v1853_v28 = vrot.slane %v1551_v59, %v5592_v55  ;;  %v1857_v29 = vrot.slane %v1551_v59, %v5595_v5  ;;  %v2952_v30 = vcombine.low %v1829_v15, %v1833_v16  ;;  %v2953_v31 = vcombine.low %v1837_v22, %v1841_v23 }
 0x1f3   :  { %4239 = vperm.xlu0 %4806, %v2902_v25   ;;  %v2936_v32 = vcombine.low %v2927_v21, %v2934_v26  ;;  %v2943_v33 = vrot.slane %v2935_v8, %v5598_v57  ;;  %v2954_v34 = vcombine.low %v1845_v24, %v1849_v27  ;;  %v1861_v35 = vrot.slane %v1553_v20, %v5574_v49 }
 0x1f4   :  { %v2955_v36 = vcombine.low %v1853_v28, %v1857_v29  ;;  %v2962_v37 = vrot.slane %v2952_v30, %v5598_v57  ;;  %v2969_v38 = vrot.slane %v2953_v31, %v5598_v57  ;;  %v1865_v39 = vrot.slane %v1553_v20, %v5577_v50  ;;  %v1557_v15 = vpop.xlane.xlu0 %1556 }
 0x1f5   :  { %v2950_v40 = vrot.slane %v2936_v32, %v5598_v57  ;;  %v2976_v41 = vrot.slane %v2954_v34, %v5598_v57  ;;  %v1869_v42 = vrot.slane %v1553_v20, %v5580_v51  ;;  %v1873_v43 = vrot.slane %v1553_v20, %v5583_v52 }
 0x1f6   :  { %v2983_v45 = vrot.slane %v2955_v36, %v5598_v57  ;;  %v2984_v46 = vcombine.low %v2962_v37, %v2969_v38  ;;  %v1877_v48 = vrot.slane %v1553_v20, %v5586_v53  ;;  %v1881_v56 = vrot.slane %v1553_v20, %v5589_v54 }
 0x1f7   :  { %v2951_v58 = vcombine.low %v2943_v33, %v2950_v40  ;;  %v1885_v59 = vrot.slane %v1553_v20, %v5592_v55  ;;  %v1889_v61 = vrot.slane %v1553_v20, %v5595_v5  ;;  %v3001_v62 = vcombine.low %v1861_v35, %v1865_v39 }
 0x1f8   :  { %v2985_v0 = vcombine.low %v2976_v41, %v2983_v45  ;;  %v2992_v1 = vrot.slane %v2984_v46, %v5598_v57  ;;  %v3002_v3 = vcombine.low %v1869_v42, %v1873_v43  ;;  %v3003_v4 = vcombine.low %v1877_v48, %v1881_v56  ;;  %v1559_v34 = vpop.xlane.xlu1 %1558 }
 0x1f9   :  { %4242 = vperm.xlu1 %4807, %v2951_v58   ;;  %v3004_v6 = vcombine.low %v1885_v59, %v1889_v61  ;;  %v3011_v7 = vrot.slane %v3001_v62, %v5598_v57  ;;  %v1893_v9 = vrot.slane %v1555_v44, %v5574_v49  ;;  %v1897_v10 = vrot.slane %v1555_v44, %v5577_v50 }
 0x1fa   :  { %v2999_v11 = vrot.slane %v2985_v0, %v5598_v57  ;;  %v3018_v12 = vrot.slane %v3002_v3, %v5598_v57  ;;  %v3025_v13 = vrot.slane %v3003_v4, %v5598_v57  ;;  %v1901_v14 = vrot.slane %v1555_v44, %v5580_v51 }
 0x1fb   :  { %v3032_v16 = vrot.slane %v3004_v6, %v5598_v57  ;;  %v1905_v17 = vrot.slane %v1555_v44, %v5583_v52  ;;  %v1909_v18 = vrot.slane %v1555_v44, %v5586_v53  ;;  %v1913_v2 = vrot.slane %v1555_v44, %v5589_v54 }
 0x1fc   :  { %v3000_v19 = vcombine.low %v2992_v1, %v2999_v11  ;;  %v3033_v20 = vcombine.low %v3011_v7, %v3018_v12  ;;  %v1917_v21 = vrot.slane %v1555_v44, %v5592_v55  ;;  %v1921_v22 = vrot.slane %v1555_v44, %v5595_v5  ;;  %v1561_v3 = vpop.xlane.xlu0 %1560 }
 0x1fd   :  { %v3034_v23 = vcombine.low %v3025_v13, %v3032_v16  ;;  %v3050_v24 = vcombine.low %v1893_v9, %v1897_v10  ;;  %v3051_v25 = vcombine.low %v1901_v14, %v1905_v17  ;;  %v3052_v26 = vcombine.low %v1909_v18, %v1913_v2 }
 0x1fe   :  { %4245 = vperm.xlu0 %4806, %v3000_v19   ;;  %v3041_v8 = vrot.slane %v3033_v20, %v5598_v57  ;;  %v3053_v27 = vcombine.low %v1917_v21, %v1921_v22  ;;  %v1925_v28 = vrot.slane %v1557_v15, %v5574_v49  ;;  %v1929_v29 = vrot.slane %v1557_v15, %v5577_v50 }
 0x1ff   :  { %v3048_v30 = vrot.slane %v3034_v23, %v5598_v57  ;;  %v3060_v31 = vrot.slane %v3050_v24, %v5598_v57  ;;  %v3067_v32 = vrot.slane %v3051_v25, %v5598_v57  ;;  %v3074_v33 = vrot.slane %v3052_v26, %v5598_v57 }
 0x200   :  { %v3081_v35 = vrot.slane %v3053_v27, %v5598_v57  ;;  %v1933_v36 = vrot.slane %v1557_v15, %v5580_v51  ;;  %v1937_v37 = vrot.slane %v1557_v15, %v5583_v52  ;;  %v1941_v38 = vrot.slane %v1557_v15, %v5586_v53 }
 0x201   :  { %v3049_v39 = vcombine.low %v3041_v8, %v3048_v30  ;;  %v3082_v40 = vcombine.low %v3060_v31, %v3067_v32  ;;  %v1945_v41 = vrot.slane %v1557_v15, %v5589_v54  ;;  %v1949_v42 = vrot.slane %v1557_v15, %v5592_v55 }
 0x202   :  { %v3083_v43 = vcombine.low %v3074_v33, %v3081_v35  ;;  %v1953_v44 = vrot.slane %v1557_v15, %v5595_v5  ;;  %v3099_v45 = vcombine.low %v1925_v28, %v1929_v29  ;;  %v3100_v46 = vcombine.low %v1933_v36, %v1937_v37  ;;  %v1563_v28 = vpop.xlane.xlu1 %1562 }
 0x203   :  { %4248 = vperm.xlu1 %4807, %v3049_v39   ;;  %v3090_v48 = vrot.slane %v3082_v40, %v5598_v57  ;;  %v3101_v56 = vcombine.low %v1941_v38, %v1945_v41  ;;  %v1957_v58 = vrot.slane %v1559_v34, %v5574_v49  ;;  %v1961_v59 = vrot.slane %v1559_v34, %v5577_v50 }
 0x204   :  { %v3097_v61 = vrot.slane %v3083_v43, %v5598_v57  ;;  %v3102_v62 = vcombine.low %v1949_v42, %v1953_v44  ;;  %v3109_v0 = vrot.slane %v3099_v45, %v5598_v57  ;;  %v3116_v1 = vrot.slane %v3100_v46, %v5598_v57 }
 0x205   :  { %v3123_v4 = vrot.slane %v3101_v56, %v5598_v57  ;;  %v1965_v6 = vrot.slane %v1559_v34, %v5580_v51  ;;  %v1969_v7 = vrot.slane %v1559_v34, %v5583_v52  ;;  %v1973_v9 = vrot.slane %v1559_v34, %v5586_v53 }
 0x206   :  { %v3098_v10 = vcombine.low %v3090_v48, %v3097_v61  ;;  %v3130_v11 = vrot.slane %v3102_v62, %v5598_v57  ;;  %v3131_v12 = vcombine.low %v3109_v0, %v3116_v1  ;;  %v1977_v13 = vrot.slane %v1559_v34, %v5589_v54 }
 0x207   :  { %v1981_v14 = vrot.slane %v1559_v34, %v5592_v55  ;;  %v1985_v15 = vrot.slane %v1559_v34, %v5595_v5  ;;  %v3148_v16 = vcombine.low %v1957_v58, %v1961_v59  ;;  %v3149_v17 = vcombine.low %v1965_v6, %v1969_v7  ;;  %v1565_v58 = vpop.xlane.xlu0 %1564 }
 0x208   :  { %4251 = vperm.xlu0 %4806, %v3098_v10   ;;  %v3132_v18 = vcombine.low %v3123_v4, %v3130_v11  ;;  %v3139_v2 = vrot.slane %v3131_v12, %v5598_v57  ;;  %v3150_v19 = vcombine.low %v1973_v9, %v1977_v13  ;;  %v1989_v20 = vrot.slane %v1561_v3, %v5574_v49 }
 0x209   :  { %v3151_v21 = vcombine.low %v1981_v14, %v1985_v15  ;;  %v3158_v22 = vrot.slane %v3148_v16, %v5598_v57  ;;  %v3165_v23 = vrot.slane %v3149_v17, %v5598_v57  ;;  %v1993_v24 = vrot.slane %v1561_v3, %v5577_v50 }
 0x20a   :  { %v3146_v25 = vrot.slane %v3132_v18, %v5598_v57  ;;  %v3172_v26 = vrot.slane %v3150_v19, %v5598_v57  ;;  %v1997_v8 = vrot.slane %v1561_v3, %v5580_v51  ;;  %v2001_v27 = vrot.slane %v1561_v3, %v5583_v52 }
 0x20b   :  { %v3179_v29 = vrot.slane %v3151_v21, %v5598_v57  ;;  %v3180_v30 = vcombine.low %v3158_v22, %v3165_v23  ;;  %v2005_v31 = vrot.slane %v1561_v3, %v5586_v53  ;;  %v2009_v32 = vrot.slane %v1561_v3, %v5589_v54 }
 0x20c   :  { %v3147_v33 = vcombine.low %v3139_v2, %v3146_v25  ;;  %v2013_v34 = vrot.slane %v1561_v3, %v5592_v55  ;;  %v2017_v35 = vrot.slane %v1561_v3, %v5595_v5  ;;  %v3197_v36 = vcombine.low %v1989_v20, %v1993_v24  ;;  %v5772_v3 = vpop.xlane.xlu1 %1566 }
 0x20d   :  { %v3181_v37 = vcombine.low %v3172_v26, %v3179_v29  ;;  %v3188_v38 = vrot.slane %v3180_v30, %v5598_v57  ;;  %v3198_v39 = vcombine.low %v1997_v8, %v2001_v27  ;;  %v3199_v40 = vcombine.low %v2005_v31, %v2009_v32  ;;  %v5787_v26 = vpop.xlane.xlu0 %1568 }
 0x20e   :  { %4254 = vperm.xlu1 %4807, %v3147_v33   ;;  %v3200_v41 = vcombine.low %v2013_v34, %v2017_v35  ;;  %v3207_v42 = vrot.slane %v3197_v36, %v5598_v57  ;;  %v2021_v43 = vrot.slane %v1563_v28, %v5574_v49  ;;  %v2025_v44 = vrot.slane %v1563_v28, %v5577_v50 }
 0x20f   :  { %v3195_v45 = vrot.slane %v3181_v37, %v5598_v57  ;;  %v3214_v46 = vrot.slane %v3198_v39, %v5598_v57  ;;  %v3221_v48 = vrot.slane %v3199_v40, %v5598_v57  ;;  %v2029_v56 = vrot.slane %v1563_v28, %v5580_v51 }
 0x210   :  { %v3228_v59 = vrot.slane %v3200_v41, %v5598_v57  ;;  %v2033_v61 = vrot.slane %v1563_v28, %v5583_v52  ;;  %v2037_v62 = vrot.slane %v1563_v28, %v5586_v53  ;;  %v2041_v0 = vrot.slane %v1563_v28, %v5589_v54  ;;  %v1571_v21 = vpop.xlane.xlu1 %1570 }
 0x211   :  { %v3196_v1 = vcombine.low %v3188_v38, %v3195_v45  ;;  %v3229_v4 = vcombine.low %v3207_v42, %v3214_v46  ;;  %v2045_v6 = vrot.slane %v1563_v28, %v5592_v55  ;;  %v2049_v7 = vrot.slane %v1563_v28, %v5595_v5 }
 0x212   :  { %v3230_v9 = vcombine.low %v3221_v48, %v3228_v59  ;;  %v3246_v10 = vcombine.low %v2021_v43, %v2025_v44  ;;  %v3247_v11 = vcombine.low %v2029_v56, %v2033_v61  ;;  %v3248_v12 = vcombine.low %v2037_v62, %v2041_v0 }
 0x213   :  { %4257 = vperm.xlu0 %4806, %v3196_v1   ;;  %v3237_v13 = vrot.slane %v3229_v4, %v5598_v57  ;;  %v3249_v14 = vcombine.low %v2045_v6, %v2049_v7  ;;  %v2053_v15 = vrot.slane %v1565_v58, %v5574_v49  ;;  %v2057_v16 = vrot.slane %v1565_v58, %v5577_v50 }
 0x214   :  { %v3244_v17 = vrot.slane %v3230_v9, %v5598_v57  ;;  %v3256_v18 = vrot.slane %v3246_v10, %v5598_v57  ;;  %v3263_v2 = vrot.slane %v3247_v11, %v5598_v57  ;;  %v3270_v19 = vrot.slane %v3248_v12, %v5598_v57  ;;  %v1573_v42 = vpop.xlane.xlu0 %1572 }
 0x215   :  { %v3277_v20 = vrot.slane %v3249_v14, %v5598_v57  ;;  %v2061_v22 = vrot.slane %v1565_v58, %v5580_v51  ;;  %v2065_v23 = vrot.slane %v1565_v58, %v5583_v52  ;;  %v2069_v24 = vrot.slane %v1565_v58, %v5586_v53 }
 0x216   :  { %v3245_v25 = vcombine.low %v3237_v13, %v3244_v17  ;;  %v3278_v8 = vcombine.low %v3256_v18, %v3263_v2  ;;  %v2073_v27 = vrot.slane %v1565_v58, %v5589_v54  ;;  %v2077_v28 = vrot.slane %v1565_v58, %v5592_v55 }
 0x217   :  { %v3279_v29 = vcombine.low %v3270_v19, %v3277_v20  ;;  %v2081_v30 = vrot.slane %v1565_v58, %v5595_v5  ;;  %v3295_v31 = vcombine.low %v2053_v15, %v2057_v16  ;;  %v3296_v32 = vcombine.low %v2061_v22, %v2065_v23 }
 0x218   :  { %4260 = vperm.xlu0 %4806, %v3245_v25   ;;  %v3286_v33 = vrot.slane %v3278_v8, %v5598_v57  ;;  %v3297_v34 = vcombine.low %v2069_v24, %v2073_v27  ;;  %v2149_v35 = vrot.slane %v1571_v21, %v5574_v49  ;;  %v2153_v36 = vrot.slane %v1571_v21, %v5577_v50  ;;  %v1575_v17 = vpop.xlane.xlu1 %1574 }
 0x219   :  { %v3293_v37 = vrot.slane %v3279_v29, %v5598_v57  ;;  %v3298_v38 = vcombine.low %v2077_v28, %v2081_v30  ;;  %v3305_v39 = vrot.slane %v3295_v31, %v5598_v57  ;;  %v3312_v40 = vrot.slane %v3296_v32, %v5598_v57 }
 0x21a   :  { %v3319_v41 = vrot.slane %v3297_v34, %v5598_v57  ;;  %v2157_v43 = vrot.slane %v1571_v21, %v5580_v51  ;;  %v2161_v44 = vrot.slane %v1571_v21, %v5583_v52  ;;  %v2165_v45 = vrot.slane %v1571_v21, %v5586_v53 }
 0x21b   :  { %v3294_v46 = vcombine.low %v3286_v33, %v3293_v37  ;;  %v3326_v48 = vrot.slane %v3298_v38, %v5598_v57  ;;  %v3327_v56 = vcombine.low %v3305_v39, %v3312_v40  ;;  %v2169_v58 = vrot.slane %v1571_v21, %v5589_v54 }
 0x21c   :  { %v2173_v59 = vrot.slane %v1571_v21, %v5592_v55  ;;  %v2177_v61 = vrot.slane %v1571_v21, %v5595_v5  ;;  %v3442_v62 = vcombine.low %v2149_v35, %v2153_v36  ;;  %v3443_v0 = vcombine.low %v2157_v43, %v2161_v44  ;;  %v1577_v37 = vpop.xlane.xlu0 %1576 }
 0x21d   :  { %4263 = vperm.xlu0 %4806, %v3294_v46   ;;  %v3328_v1 = vcombine.low %v3319_v41, %v3326_v48  ;;  %v3335_v4 = vrot.slane %v3327_v56, %v5598_v57  ;;  %v3444_v6 = vcombine.low %v2165_v45, %v2169_v58  ;;  %v2181_v7 = vrot.slane %v1573_v42, %v5574_v49 }
 0x21e   :  { %v3445_v9 = vcombine.low %v2173_v59, %v2177_v61  ;;  %v3452_v10 = vrot.slane %v3442_v62, %v5598_v57  ;;  %v3459_v11 = vrot.slane %v3443_v0, %v5598_v57  ;;  %v2185_v12 = vrot.slane %v1573_v42, %v5577_v50 }
 0x21f   :  { %v3342_v13 = vrot.slane %v3328_v1, %v5598_v57  ;;  %v3466_v14 = vrot.slane %v3444_v6, %v5598_v57  ;;  %v2189_v15 = vrot.slane %v1573_v42, %v5580_v51  ;;  %v2193_v16 = vrot.slane %v1573_v42, %v5583_v52 }
 0x220   :  { %v3473_v18 = vrot.slane %v3445_v9, %v5598_v57  ;;  %v3474_v2 = vcombine.low %v3452_v10, %v3459_v11  ;;  %v2197_v19 = vrot.slane %v1573_v42, %v5586_v53  ;;  %v2201_v20 = vrot.slane %v1573_v42, %v5589_v54  ;;  %v1579_v9 = vpop.xlane.xlu1 %1578 }
 0x221   :  { %v3343_v21 = vcombine.low %v3335_v4, %v3342_v13  ;;  %v2205_v22 = vrot.slane %v1573_v42, %v5592_v55  ;;  %v2209_v23 = vrot.slane %v1573_v42, %v5595_v5  ;;  %v3491_v24 = vcombine.low %v2181_v7, %v2185_v12 }
 0x222   :  { %v3475_v25 = vcombine.low %v3466_v14, %v3473_v18  ;;  %v3482_v8 = vrot.slane %v3474_v2, %v5598_v57  ;;  %v3492_v27 = vcombine.low %v2189_v15, %v2193_v16  ;;  %v3493_v28 = vcombine.low %v2197_v19, %v2201_v20 }
 0x223   :  { %4266 = vperm.xlu0 %4806, %v3343_v21   ;;  %v3494_v29 = vcombine.low %v2205_v22, %v2209_v23  ;;  %v3501_v30 = vrot.slane %v3491_v24, %v5598_v57  ;;  %v2213_v31 = vrot.slane %v1575_v17, %v5574_v49  ;;  %v2217_v32 = vrot.slane %v1575_v17, %v5577_v50 }
 0x224   :  { %v3489_v33 = vrot.slane %v3475_v25, %v5598_v57  ;;  %v3508_v34 = vrot.slane %v3492_v27, %v5598_v57  ;;  %v3515_v35 = vrot.slane %v3493_v28, %v5598_v57  ;;  %v2221_v36 = vrot.slane %v1575_v17, %v5580_v51 }
 0x225   :  { %v3522_v38 = vrot.slane %v3494_v29, %v5598_v57  ;;  %v2225_v39 = vrot.slane %v1575_v17, %v5583_v52  ;;  %v2229_v40 = vrot.slane %v1575_v17, %v5586_v53  ;;  %v2233_v41 = vrot.slane %v1575_v17, %v5589_v54  ;;  %v1581_v29 = vpop.xlane.xlu0 %1580 }
 0x226   :  { %v3490_v42 = vcombine.low %v3482_v8, %v3489_v33  ;;  %v3523_v43 = vcombine.low %v3501_v30, %v3508_v34  ;;  %v2237_v44 = vrot.slane %v1575_v17, %v5592_v55  ;;  %v2241_v45 = vrot.slane %v1575_v17, %v5595_v5 }
 0x227   :  { %v3524_v46 = vcombine.low %v3515_v35, %v3522_v38  ;;  %v3540_v48 = vcombine.low %v2213_v31, %v2217_v32  ;;  %v3541_v56 = vcombine.low %v2221_v36, %v2225_v39  ;;  %v3542_v58 = vcombine.low %v2229_v40, %v2233_v41 }
 0x228   :  { %4275 = vperm.xlu1 %4807, %v3490_v42   ;;  %v3531_v59 = vrot.slane %v3523_v43, %v5598_v57  ;;  %v3543_v61 = vcombine.low %v2237_v44, %v2241_v45  ;;  %v2245_v62 = vrot.slane %v1577_v37, %v5574_v49  ;;  %v2249_v0 = vrot.slane %v1577_v37, %v5577_v50 }
 0x229   :  { %v3538_v1 = vrot.slane %v3524_v46, %v5598_v57  ;;  %v3550_v4 = vrot.slane %v3540_v48, %v5598_v57  ;;  %v3557_v6 = vrot.slane %v3541_v56, %v5598_v57  ;;  %v3564_v7 = vrot.slane %v3542_v58, %v5598_v57 }
 0x22a   :  { %v3571_v10 = vrot.slane %v3543_v61, %v5598_v57  ;;  %v2253_v11 = vrot.slane %v1577_v37, %v5580_v51  ;;  %v2257_v12 = vrot.slane %v1577_v37, %v5583_v52  ;;  %v2261_v13 = vrot.slane %v1577_v37, %v5586_v53 }
 0x22b   :  { %v3539_v14 = vcombine.low %v3531_v59, %v3538_v1  ;;  %v3572_v15 = vcombine.low %v3550_v4, %v3557_v6  ;;  %v2265_v16 = vrot.slane %v1577_v37, %v5589_v54  ;;  %v2269_v17 = vrot.slane %v1577_v37, %v5592_v55  ;;  %v1583_v1 = vpop.xlane.xlu1 %1582 }
 0x22c   :  { %v3573_v18 = vcombine.low %v3564_v7, %v3571_v10  ;;  %v2273_v2 = vrot.slane %v1577_v37, %v5595_v5  ;;  %v3589_v19 = vcombine.low %v2245_v62, %v2249_v0  ;;  %v3590_v20 = vcombine.low %v2253_v11, %v2257_v12 }
 0x22d   :  { %4278 = vperm.xlu0 %4806, %v3539_v14   ;;  %v3580_v21 = vrot.slane %v3572_v15, %v5598_v57  ;;  %v3591_v22 = vcombine.low %v2261_v13, %v2265_v16  ;;  %v2277_v23 = vrot.slane %v1579_v9, %v5574_v49  ;;  %v2281_v24 = vrot.slane %v1579_v9, %v5577_v50 }
 0x22e   :  { %v3587_v25 = vrot.slane %v3573_v18, %v5598_v57  ;;  %v3592_v8 = vcombine.low %v2269_v17, %v2273_v2  ;;  %v3599_v27 = vrot.slane %v3589_v19, %v5598_v57  ;;  %v3606_v28 = vrot.slane %v3590_v20, %v5598_v57 }
 0x22f   :  { %v3613_v30 = vrot.slane %v3591_v22, %v5598_v57  ;;  %v2285_v31 = vrot.slane %v1579_v9, %v5580_v51  ;;  %v2289_v32 = vrot.slane %v1579_v9, %v5583_v52  ;;  %v2293_v33 = vrot.slane %v1579_v9, %v5586_v53 }
 0x230   :  { %v3588_v34 = vcombine.low %v3580_v21, %v3587_v25  ;;  %v3620_v35 = vrot.slane %v3592_v8, %v5598_v57  ;;  %v3621_v36 = vcombine.low %v3599_v27, %v3606_v28  ;;  %v2297_v37 = vrot.slane %v1579_v9, %v5589_v54  ;;  %v1585_v25 = vpop.xlane.xlu0 %1584 }
 0x231   :  { %v2301_v38 = vrot.slane %v1579_v9, %v5592_v55  ;;  %v2305_v39 = vrot.slane %v1579_v9, %v5595_v5  ;;  %v3638_v40 = vcombine.low %v2277_v23, %v2281_v24  ;;  %v3639_v41 = vcombine.low %v2285_v31, %v2289_v32 }
 0x232   :  { %4281 = vperm.xlu1 %4807, %v3588_v34   ;;  %v3622_v42 = vcombine.low %v3613_v30, %v3620_v35  ;;  %v3629_v43 = vrot.slane %v3621_v36, %v5598_v57  ;;  %v3640_v44 = vcombine.low %v2293_v33, %v2297_v37  ;;  %v2309_v45 = vrot.slane %v1581_v29, %v5574_v49 }
 0x233   :  { %v3641_v46 = vcombine.low %v2301_v38, %v2305_v39  ;;  %v3648_v48 = vrot.slane %v3638_v40, %v5598_v57  ;;  %v3655_v56 = vrot.slane %v3639_v41, %v5598_v57  ;;  %v2313_v58 = vrot.slane %v1581_v29, %v5577_v50 }
 0x234   :  { %v3636_v59 = vrot.slane %v3622_v42, %v5598_v57  ;;  %v3662_v61 = vrot.slane %v3640_v44, %v5598_v57  ;;  %v2317_v62 = vrot.slane %v1581_v29, %v5580_v51  ;;  %v2321_v0 = vrot.slane %v1581_v29, %v5583_v52 }
 0x235   :  { %v3669_v4 = vrot.slane %v3641_v46, %v5598_v57  ;;  %v3670_v6 = vcombine.low %v3648_v48, %v3655_v56  ;;  %v2325_v7 = vrot.slane %v1581_v29, %v5586_v53  ;;  %v2329_v9 = vrot.slane %v1581_v29, %v5589_v54  ;;  %v1587_v46 = vpop.xlane.xlu1 %1586 }
 0x236   :  { %v3637_v10 = vcombine.low %v3629_v43, %v3636_v59  ;;  %v2333_v11 = vrot.slane %v1581_v29, %v5592_v55  ;;  %v2337_v12 = vrot.slane %v1581_v29, %v5595_v5  ;;  %v3687_v13 = vcombine.low %v2309_v45, %v2313_v58 }
 0x237   :  { %v3671_v14 = vcombine.low %v3662_v61, %v3669_v4  ;;  %v3678_v15 = vrot.slane %v3670_v6, %v5598_v57  ;;  %v3688_v16 = vcombine.low %v2317_v62, %v2321_v0  ;;  %v3689_v17 = vcombine.low %v2325_v7, %v2329_v9 }
 0x238   :  { %4284 = vperm.xlu0 %4806, %v3637_v10   ;;  %v3690_v18 = vcombine.low %v2333_v11, %v2337_v12  ;;  %v3697_v2 = vrot.slane %v3687_v13, %v5598_v57  ;;  %v2341_v19 = vrot.slane %v1583_v1, %v5574_v49  ;;  %v2345_v20 = vrot.slane %v1583_v1, %v5577_v50 }
 0x239   :  { %v3685_v21 = vrot.slane %v3671_v14, %v5598_v57  ;;  %v3704_v22 = vrot.slane %v3688_v16, %v5598_v57  ;;  %v3711_v23 = vrot.slane %v3689_v17, %v5598_v57  ;;  %v2349_v24 = vrot.slane %v1583_v1, %v5580_v51 }
 0x23a   :  { %v3718_v8 = vrot.slane %v3690_v18, %v5598_v57  ;;  %v2353_v27 = vrot.slane %v1583_v1, %v5583_v52  ;;  %v2357_v28 = vrot.slane %v1583_v1, %v5586_v53  ;;  %v2361_v29 = vrot.slane %v1583_v1, %v5589_v54  ;;  %v1589_v18 = vpop.xlane.xlu0 %1588 }
 0x23b   :  { %v3686_v30 = vcombine.low %v3678_v15, %v3685_v21  ;;  %v3719_v31 = vcombine.low %v3697_v2, %v3704_v22  ;;  %v2365_v32 = vrot.slane %v1583_v1, %v5592_v55  ;;  %v2369_v33 = vrot.slane %v1583_v1, %v5595_v5 }
 0x23c   :  { %v3720_v34 = vcombine.low %v3711_v23, %v3718_v8  ;;  %v3736_v35 = vcombine.low %v2341_v19, %v2345_v20  ;;  %v3737_v36 = vcombine.low %v2349_v24, %v2353_v27  ;;  %v3738_v37 = vcombine.low %v2357_v28, %v2361_v29 }
 0x23d   :  { %4287 = vperm.xlu1 %4807, %v3686_v30   ;;  %v3727_v38 = vrot.slane %v3719_v31, %v5598_v57  ;;  %v3739_v39 = vcombine.low %v2365_v32, %v2369_v33  ;;  %v2373_v40 = vrot.slane %v1585_v25, %v5574_v49  ;;  %v2377_v41 = vrot.slane %v1585_v25, %v5577_v50 }
 0x23e   :  { %v3734_v42 = vrot.slane %v3720_v34, %v5598_v57  ;;  %v3746_v43 = vrot.slane %v3736_v35, %v5598_v57  ;;  %v3753_v44 = vrot.slane %v3737_v36, %v5598_v57  ;;  %v3760_v45 = vrot.slane %v3738_v37, %v5598_v57 }
 0x23f   :  { %v3767_v48 = vrot.slane %v3739_v39, %v5598_v57  ;;  %v2381_v56 = vrot.slane %v1585_v25, %v5580_v51  ;;  %v2385_v58 = vrot.slane %v1585_v25, %v5583_v52  ;;  %v2389_v59 = vrot.slane %v1585_v25, %v5586_v53 }
 0x240   :  { %v3735_v61 = vcombine.low %v3727_v38, %v3734_v42  ;;  %v3768_v62 = vcombine.low %v3746_v43, %v3753_v44  ;;  %v2393_v0 = vrot.slane %v1585_v25, %v5589_v54  ;;  %v2397_v1 = vrot.slane %v1585_v25, %v5592_v55  ;;  %v1591_v42 = vpop.xlane.xlu1 %1590 }
 0x241   :  { %v3769_v4 = vcombine.low %v3760_v45, %v3767_v48  ;;  %v2401_v6 = vrot.slane %v1585_v25, %v5595_v5  ;;  %v3785_v7 = vcombine.low %v2373_v40, %v2377_v41  ;;  %v3786_v9 = vcombine.low %v2381_v56, %v2385_v58 }
 0x242   :  { %4290 = vperm.xlu0 %4806, %v3735_v61   ;;  %v3776_v10 = vrot.slane %v3768_v62, %v5598_v57  ;;  %v3787_v11 = vcombine.low %v2389_v59, %v2393_v0  ;;  %v2405_v12 = vrot.slane %v1587_v46, %v5574_v49  ;;  %v2409_v13 = vrot.slane %v1587_v46, %v5577_v50 }
 0x243   :  { %v3783_v14 = vrot.slane %v3769_v4, %v5598_v57  ;;  %v3788_v15 = vcombine.low %v2397_v1, %v2401_v6  ;;  %v3795_v16 = vrot.slane %v3785_v7, %v5598_v57  ;;  %v3802_v17 = vrot.slane %v3786_v9, %v5598_v57 }
 0x244   :  { %v3809_v2 = vrot.slane %v3787_v11, %v5598_v57  ;;  %v2413_v19 = vrot.slane %v1587_v46, %v5580_v51  ;;  %v2417_v20 = vrot.slane %v1587_v46, %v5583_v52  ;;  %v2421_v21 = vrot.slane %v1587_v46, %v5586_v53 }
 0x245   :  { %v3784_v22 = vcombine.low %v3776_v10, %v3783_v14  ;;  %v3816_v23 = vrot.slane %v3788_v15, %v5598_v57  ;;  %v3817_v24 = vcombine.low %v3795_v16, %v3802_v17  ;;  %v2425_v25 = vrot.slane %v1587_v46, %v5589_v54 }
 0x246   :  { %v2429_v8 = vrot.slane %v1587_v46, %v5592_v55  ;;  %v2433_v27 = vrot.slane %v1587_v46, %v5595_v5  ;;  %v3834_v28 = vcombine.low %v2405_v12, %v2409_v13  ;;  %v3835_v29 = vcombine.low %v2413_v19, %v2417_v20 }
 0x247   :  { %4293 = vperm.xlu1 %4807, %v3784_v22   ;;  %v3818_v30 = vcombine.low %v3809_v2, %v3816_v23  ;;  %v3825_v31 = vrot.slane %v3817_v24, %v5598_v57  ;;  %v3836_v32 = vcombine.low %v2421_v21, %v2425_v25  ;;  %v2437_v33 = vrot.slane %v1589_v18, %v5574_v49 }
 0x248   :  { %v3837_v34 = vcombine.low %v2429_v8, %v2433_v27  ;;  %v3844_v35 = vrot.slane %v3834_v28, %v5598_v57  ;;  %v3851_v36 = vrot.slane %v3835_v29, %v5598_v57  ;;  %v2441_v37 = vrot.slane %v1589_v18, %v5577_v50 }
 0x249   :  { %v3832_v38 = vrot.slane %v3818_v30, %v5598_v57  ;;  %v3858_v39 = vrot.slane %v3836_v32, %v5598_v57  ;;  %v2445_v40 = vrot.slane %v1589_v18, %v5580_v51  ;;  %v2449_v41 = vrot.slane %v1589_v18, %v5583_v52 }
 0x24a   :  { %v3865_v43 = vrot.slane %v3837_v34, %v5598_v57  ;;  %v3866_v44 = vcombine.low %v3844_v35, %v3851_v36  ;;  %v2453_v45 = vrot.slane %v1589_v18, %v5586_v53  ;;  %v2457_v46 = vrot.slane %v1589_v18, %v5589_v54 }
 0x24b   :  { %v3833_v48 = vcombine.low %v3825_v31, %v3832_v38  ;;  %v2461_v56 = vrot.slane %v1589_v18, %v5592_v55  ;;  %v2465_v58 = vrot.slane %v1589_v18, %v5595_v5  ;;  %v3883_v59 = vcombine.low %v2437_v33, %v2441_v37  ;;  %v1593_v33 = vpop.xlane.xlu0 %1592 }
 0x24c   :  { %v3867_v61 = vcombine.low %v3858_v39, %v3865_v43  ;;  %v3874_v62 = vrot.slane %v3866_v44, %v5598_v57  ;;  %v3884_v0 = vcombine.low %v2445_v40, %v2449_v41  ;;  %v3885_v1 = vcombine.low %v2453_v45, %v2457_v46 }
 0x24d   :  { %4296 = vperm.xlu0 %4806, %v3833_v48   ;;  %v3886_v4 = vcombine.low %v2461_v56, %v2465_v58  ;;  %v3893_v6 = vrot.slane %v3883_v59, %v5598_v57  ;;  %v2469_v7 = vrot.slane %v1591_v42, %v5574_v49  ;;  %v2473_v9 = vrot.slane %v1591_v42, %v5577_v50 }
 0x24e   :  { %v3881_v10 = vrot.slane %v3867_v61, %v5598_v57  ;;  %v3900_v11 = vrot.slane %v3884_v0, %v5598_v57  ;;  %v3907_v12 = vrot.slane %v3885_v1, %v5598_v57  ;;  %v2477_v13 = vrot.slane %v1591_v42, %v5580_v51 }
 0x24f   :  { %v3914_v14 = vrot.slane %v3886_v4, %v5598_v57  ;;  %v2481_v15 = vrot.slane %v1591_v42, %v5583_v52  ;;  %v2485_v16 = vrot.slane %v1591_v42, %v5586_v53  ;;  %v2489_v17 = vrot.slane %v1591_v42, %v5589_v54 }
 0x250   :  { %v3882_v18 = vcombine.low %v3874_v62, %v3881_v10  ;;  %v3915_v2 = vcombine.low %v3893_v6, %v3900_v11  ;;  %v2493_v19 = vrot.slane %v1591_v42, %v5592_v55  ;;  %v2497_v20 = vrot.slane %v1591_v42, %v5595_v5 }
 0x251   :  { %v3916_v21 = vcombine.low %v3907_v12, %v3914_v14  ;;  %v3932_v22 = vcombine.low %v2469_v7, %v2473_v9  ;;  %v3933_v23 = vcombine.low %v2477_v13, %v2481_v15  ;;  %v3934_v24 = vcombine.low %v2485_v16, %v2489_v17 }
 0x252   :  { %4299 = vperm.xlu1 %4807, %v3882_v18   ;;  %v3923_v25 = vrot.slane %v3915_v2, %v5598_v57  ;;  %v3935_v8 = vcombine.low %v2493_v19, %v2497_v20  ;;  %v2085_v27 = vrot.slane %v5772_v3, %v5574_v49  ;;  %v2089_v28 = vrot.slane %v5772_v3, %v5577_v50 }
 0x253   :  { %v3930_v29 = vrot.slane %v3916_v21, %v5598_v57  ;;  %v3942_v30 = vrot.slane %v3932_v22, %v5598_v57  ;;  %v3949_v31 = vrot.slane %v3933_v23, %v5598_v57  ;;  %v3956_v32 = vrot.slane %v3934_v24, %v5598_v57 }
 0x254   :  { %v3963_v34 = vrot.slane %v3935_v8, %v5598_v57  ;;  %v2093_v35 = vrot.slane %v5772_v3, %v5580_v51  ;;  %v2097_v36 = vrot.slane %v5772_v3, %v5583_v52  ;;  %v2101_v37 = vrot.slane %v5772_v3, %v5586_v53 }
 0x255   :  { %v3931_v38 = vcombine.low %v3923_v25, %v3930_v29  ;;  %v3964_v39 = vcombine.low %v3942_v30, %v3949_v31  ;;  %v2105_v40 = vrot.slane %v5772_v3, %v5589_v54  ;;  %v2109_v41 = vrot.slane %v5772_v3, %v5592_v55 }
 0x256   :  { %v3965_v42 = vcombine.low %v3956_v32, %v3963_v34  ;;  %v2113_v43 = vrot.slane %v5772_v3, %v5595_v5  ;;  %v3344_v44 = vcombine.low %v2085_v27, %v2089_v28  ;;  %v3345_v45 = vcombine.low %v2093_v35, %v2097_v36  ;;  %v1595_v27 = vpop.xlane.xlu1 %1594 }
 0x257   :  { %4302 = vperm.xlu0 %4806, %v3931_v38   ;;  %v3972_v46 = vrot.slane %v3964_v39, %v5598_v57  ;;  %v3346_v48 = vcombine.low %v2101_v37, %v2105_v40  ;;  %v2501_v56 = vrot.slane %v1593_v33, %v5574_v49  ;;  %v2505_v58 = vrot.slane %v1593_v33, %v5577_v50 }
 0x258   :  { %v3979_v59 = vrot.slane %v3965_v42, %v5598_v57  ;;  %v3347_v61 = vcombine.low %v2109_v41, %v2113_v43  ;;  %v3354_v62 = vrot.slane %v3344_v44, %v5598_v57  ;;  %v3361_v0 = vrot.slane %v3345_v45, %v5598_v57 }
 0x259   :  { %v3368_v1 = vrot.slane %v3346_v48, %v5598_v57  ;;  %v2509_v3 = vrot.slane %v1593_v33, %v5580_v51  ;;  %v2513_v4 = vrot.slane %v1593_v33, %v5583_v52  ;;  %v2517_v6 = vrot.slane %v1593_v33, %v5586_v53  ;;  %v1597_v48 = vpop.xlane.xlu0 %1596 }
 0x25a   :  { %v3980_v7 = vcombine.low %v3972_v46, %v3979_v59  ;;  %v3375_v9 = vrot.slane %v3347_v61, %v5598_v57  ;;  %v3376_v10 = vcombine.low %v3354_v62, %v3361_v0  ;;  %v2521_v11 = vrot.slane %v1593_v33, %v5589_v54 }
 0x25b   :  { %v2525_v12 = vrot.slane %v1593_v33, %v5592_v55  ;;  %v2529_v13 = vrot.slane %v1593_v33, %v5595_v5  ;;  %v3981_v14 = vcombine.low %v2501_v56, %v2505_v58  ;;  %v3982_v15 = vcombine.low %v2509_v3, %v2513_v4 }
 0x25c   :  { %4305 = vperm.xlu1 %4807, %v3980_v7   ;;  %v3377_v16 = vcombine.low %v3368_v1, %v3375_v9  ;;  %v3384_v17 = vrot.slane %v3376_v10, %v5598_v57  ;;  %v3983_v18 = vcombine.low %v2517_v6, %v2521_v11  ;;  %v2117_v2 = vrot.slane %v5787_v26, %v5574_v49 }
 0x25d   :  { %v3984_v19 = vcombine.low %v2525_v12, %v2529_v13  ;;  %v3991_v20 = vrot.slane %v3981_v14, %v5598_v57  ;;  %v3998_v21 = vrot.slane %v3982_v15, %v5598_v57  ;;  %v2121_v22 = vrot.slane %v5787_v26, %v5577_v50 }
 0x25e   :  { %v3391_v23 = vrot.slane %v3377_v16, %v5598_v57  ;;  %v4005_v24 = vrot.slane %v3983_v18, %v5598_v57  ;;  %v2125_v25 = vrot.slane %v5787_v26, %v5580_v51  ;;  %v2129_v8 = vrot.slane %v5787_v26, %v5583_v52  ;;  %v1599_v18 = vpop.xlane.xlu1 %1598 }
 0x25f   :  { %v4012_v28 = vrot.slane %v3984_v19, %v5598_v57  ;;  %v4013_v29 = vcombine.low %v3991_v20, %v3998_v21  ;;  %v2133_v30 = vrot.slane %v5787_v26, %v5586_v53  ;;  %v2137_v31 = vrot.slane %v5787_v26, %v5589_v54 }
 0x260   :  { %v3392_v32 = vcombine.low %v3384_v17, %v3391_v23  ;;  %v2141_v33 = vrot.slane %v5787_v26, %v5592_v55  ;;  %v2145_v34 = vrot.slane %v5787_v26, %v5595_v5  ;;  %v3393_v35 = vcombine.low %v2117_v2, %v2121_v22 }
 0x261   :  { %v4014_v36 = vcombine.low %v4005_v24, %v4012_v28  ;;  %v4021_v37 = vrot.slane %v4013_v29, %v5598_v57  ;;  %v3394_v38 = vcombine.low %v2125_v25, %v2129_v8  ;;  %v3395_v39 = vcombine.low %v2133_v30, %v2137_v31 }
 0x262   :  { %4269 = vperm.xlu0 %4806, %v3392_v32   ;;  %v3396_v40 = vcombine.low %v2141_v33, %v2145_v34  ;;  %v3403_v41 = vrot.slane %v3393_v35, %v5598_v57  ;;  %v2533_v42 = vrot.slane %v1595_v27, %v5574_v49  ;;  %v2537_v43 = vrot.slane %v1595_v27, %v5577_v50 }
 0x263   :  { %v4028_v44 = vrot.slane %v4014_v36, %v5598_v57  ;;  %v3410_v45 = vrot.slane %v3394_v38, %v5598_v57  ;;  %v3417_v26 = vrot.slane %v3395_v39, %v5598_v57  ;;  %v2541_v46 = vrot.slane %v1595_v27, %v5580_v51 }
 0x264   :  { %v3424_v56 = vrot.slane %v3396_v40, %v5598_v57  ;;  %v2545_v58 = vrot.slane %v1595_v27, %v5583_v52  ;;  %v2549_v59 = vrot.slane %v1595_v27, %v5586_v53  ;;  %v2553_v61 = vrot.slane %v1595_v27, %v5589_v54 }
 0x265   :  { %v4029_v62 = vcombine.low %v4021_v37, %v4028_v44  ;;  %v3425_v0 = vcombine.low %v3403_v41, %v3410_v45  ;;  %v2557_v1 = vrot.slane %v1595_v27, %v5592_v55  ;;  %v2561_v3 = vrot.slane %v1595_v27, %v5595_v5 }
 0x266   :  { %v3426_v4 = vcombine.low %v3417_v26, %v3424_v56  ;;  %v4030_v6 = vcombine.low %v2533_v42, %v2537_v43  ;;  %v4031_v7 = vcombine.low %v2541_v46, %v2545_v58  ;;  %v4032_v9 = vcombine.low %v2549_v59, %v2553_v61  ;;  %v1601_v42 = vpop.xlane.xlu0 %1600 }
 0x267   :  { %4308 = vperm.xlu1 %4807, %v4029_v62   ;;  %v3433_v10 = vrot.slane %v3425_v0, %v5598_v57  ;;  %v4033_v11 = vcombine.low %v2557_v1, %v2561_v3  ;;  %v2565_v12 = vrot.slane %v1597_v48, %v5574_v49  ;;  %v2569_v13 = vrot.slane %v1597_v48, %v5577_v50 }
 0x268   :  { %v3440_v14 = vrot.slane %v3426_v4, %v5598_v57  ;;  %v4040_v15 = vrot.slane %v4030_v6, %v5598_v57  ;;  %v4047_v16 = vrot.slane %v4031_v7, %v5598_v57  ;;  %v4054_v17 = vrot.slane %v4032_v9, %v5598_v57 }
 0x269   :  { %v4061_v2 = vrot.slane %v4033_v11, %v5598_v57  ;;  %v2573_v19 = vrot.slane %v1597_v48, %v5580_v51  ;;  %v2577_v20 = vrot.slane %v1597_v48, %v5583_v52  ;;  %v2581_v21 = vrot.slane %v1597_v48, %v5586_v53 }
 0x26a   :  { %v3441_v22 = vcombine.low %v3433_v10, %v3440_v14  ;;  %v4062_v23 = vcombine.low %v4040_v15, %v4047_v16  ;;  %v2585_v24 = vrot.slane %v1597_v48, %v5589_v54  ;;  %v2589_v25 = vrot.slane %v1597_v48, %v5592_v55 }
 0x26b   :  { %v4063_v8 = vcombine.low %v4054_v17, %v4061_v2  ;;  %v2593_v27 = vrot.slane %v1597_v48, %v5595_v5  ;;  %v4079_v28 = vcombine.low %v2565_v12, %v2569_v13  ;;  %v4080_v29 = vcombine.low %v2573_v19, %v2577_v20 }
 0x26c   :  { %4272 = vperm.xlu0 %4806, %v3441_v22   ;;  %v4070_v30 = vrot.slane %v4062_v23, %v5598_v57  ;;  %v4081_v31 = vcombine.low %v2581_v21, %v2585_v24  ;;  %v2597_v32 = vrot.slane %v1599_v18, %v5574_v49  ;;  %v2601_v33 = vrot.slane %v1599_v18, %v5577_v50 }
 0x26d   :  { %v4077_v34 = vrot.slane %v4063_v8, %v5598_v57  ;;  %v4082_v35 = vcombine.low %v2589_v25, %v2593_v27  ;;  %v4089_v36 = vrot.slane %v4079_v28, %v5598_v57  ;;  %v4096_v37 = vrot.slane %v4080_v29, %v5598_v57  ;;  %v4228_v27 = vpop.permute.xlu1 %4227  ;;  %v4231_v29 = vpop.permute.xlu0 %4230 }
 0x26e   :  { %v4103_v38 = vrot.slane %v4081_v31, %v5598_v57  ;;  %v2605_v39 = vrot.slane %v1599_v18, %v5580_v51  ;;  %v2609_v40 = vrot.slane %v1599_v18, %v5583_v52  ;;  %v2613_v41 = vrot.slane %v1599_v18, %v5586_v53 }
 0x26f   :  { %v4078_v43 = vcombine.low %v4070_v30, %v4077_v34  ;;  %v4110_v44 = vrot.slane %v4082_v35, %v5598_v57  ;;  %v4111_v45 = vcombine.low %v4089_v36, %v4096_v37  ;;  %v2617_v26 = vrot.slane %v1599_v18, %v5589_v54 }
 0x270   :  { %v2621_v46 = vrot.slane %v1599_v18, %v5592_v55  ;;  %v2625_v48 = vrot.slane %v1599_v18, %v5595_v5  ;;  %v4128_v56 = vcombine.low %v2597_v32, %v2601_v33  ;;  %v4129_v58 = vcombine.low %v2605_v39, %v2609_v40 }
 0x271   :  { %4311 = vperm.xlu1 %4807, %v4078_v43   ;;  %v4112_v59 = vcombine.low %v4103_v38, %v4110_v44  ;;  %v4119_v61 = vrot.slane %v4111_v45, %v5598_v57  ;;  %v4130_v62 = vcombine.low %v2613_v41, %v2617_v26  ;;  %v2629_v4 = vrot.slane %v1601_v42, %v5574_v49  ;;  %v4234_v28 = vpop.permute.xlu1 %4233  ;;  %v4240_v30 = vpop.permute.xlu0 %4239 }
 0x272   :  { %v4131_v0 = vcombine.low %v2621_v46, %v2625_v48  ;;  %v4138_v1 = vrot.slane %v4128_v56, %v5598_v57  ;;  %v4145_v3 = vrot.slane %v4129_v58, %v5598_v57  ;;  %v2633_v9 = vrot.slane %v1601_v42, %v5577_v50 }
 0x273   :  { %v4126_v6 = vrot.slane %v4112_v59, %v5598_v57  ;;  %v4152_v7 = vrot.slane %v4130_v62, %v5598_v57  ;;  %v2637_v12 = vrot.slane %v1601_v42, %v5580_v51  ;;  %v2641_v13 = vrot.slane %v1601_v42, %v5583_v52 }
 0x274   :  { %v4159_v10 = vrot.slane %v4131_v0, %v5598_v57  ;;  %v4160_v11 = vcombine.low %v4138_v1, %v4145_v3  ;;  %v2645_v15 = vrot.slane %v1601_v42, %v5586_v53  ;;  %v2649_v16 = vrot.slane %v1601_v42, %v5589_v54 }
 0x275   :  { %v4127_v14 = vcombine.low %v4119_v61, %v4126_v6  ;;  %v2653_v49 = vrot.slane %v1601_v42, %v5592_v55  ;;  %v2657_v2 = vrot.slane %v1601_v42, %v5595_v5  ;;  %v4177_v50 = vcombine.low %v2629_v4, %v2633_v9  ;;  %v4237_v31 = vpop.permute.xlu1 %4236 }
 0x276   :  { %v4161_v17 = vcombine.low %v4152_v7, %v4159_v10  ;;  %v4168_v18 = vrot.slane %v4160_v11, %v5598_v57  ;;  %v4178_v19 = vcombine.low %v2637_v12, %v2641_v13  ;;  %v4179_v20 = vcombine.low %v2645_v15, %v2649_v16 }
 0x277   :  { %4314 = vperm.xlu1 %4807, %v4127_v14   ;;  %v4180_v21 = vcombine.low %v2653_v49, %v2657_v2  ;;  %v4187_v52 = vrot.slane %v4177_v50, %v5598_v57  ;;  %v4326_v46 = vadd.s32 4294967288, %v5297_v63  ;;  %v4333_v48 = vadd.s32 4294967280, %v5297_v63 }
 0x278   :  { %v4175_v51 = vrot.slane %v4161_v17, %v5598_v57  ;;  %v4194_v53 = vrot.slane %v4178_v19, %v5598_v57  ;;  %v4201_v54 = vrot.slane %v4179_v20, %v5598_v57  ;;  %v4340_v58 = vadd.s32 4294967272, %v5297_v63 }
 0x279   :  { %v4208_v55 = vrot.slane %v4180_v21, %v5598_v57  ;;  %v6068_v32 = vpop.permute.xlu0 %4245  ;;  %v6070_v33 = vpop.permute.xlu1 %4242  ;;  %v4347_v61 = vadd.s32 4294967264, %v5297_v63  ;;  %v4329_v62 = vsub.s32 %v4326_v46, %v5571_v47  ;;  %v4354_v0 = vadd.s32 4294967256, %v5297_v63 }
 0x27a   :  { %v4176_v22 = vcombine.low %v4168_v18, %v4175_v51  ;;  %v4209_v23 = vcombine.low %v4187_v52, %v4194_v53  ;;  %v4336_v1 = vsub.s32 %v4333_v48, %v5571_v47  ;;  %v4361_v3 = vadd.s32 4294967248, %v5297_v63 }
 0x27b   :  { %v4210_v24 = vcombine.low %v4201_v54, %v4208_v55  ;;  %v4324_v4 = vsub.s32 %v5297_v63, %v5571_v47  ;;  %v6113_v6 = vsub.s32 %v4340_v58, %v5571_v47  ;;  %v6118_v9 = vsub.s32 %v4347_v61, %v5571_v47 }
 0x27c   :  { %4317 = vperm.xlu1 %4807, %v4176_v22   ;;  %v4217_v5 = vrot.slane %v4209_v23, %v5598_v57  ;;  %v4368_v10 = vadd.s32 4294967240, %v5297_v63  ;;  %v4330_v12 = vrot.slane %v4231_v29, %v4329_v62  ;;  %v6124_v13 = vsub.s32 %v4354_v0, %v5571_v47 }
 0x27d   :  { %v4224_v25 = vrot.slane %v4210_v24, %v5598_v57  ;;  %v4337_v14 = vrot.slane %v4234_v28, %v4336_v1  ;;  %v6127_v15 = vsub.s32 %v4361_v3, %v5571_v47  ;;  %v4375_v16 = vadd.s32 4294967232, %v5297_v63 }
 0x27e   :  { %v6074_v35 = vpop.permute.xlu1 %4248  ;;  %v4325_v49 = vrot.slane %v4228_v27, %v4324_v4  ;;  %v4344_v17 = vrot.slane %v4237_v31, %v6113_v6  ;;  %v4351_v2 = vrot.slane %v4240_v30, %v6118_v9  ;;  %v6135_v50 = vsub.s32 %v4368_v10, %v5571_v47 }
 0x27f   :  { %v4225_v8 = vcombine.low %v4217_v5, %v4224_v25  ;;  %v4358_v20 = vrot.slane %v6070_v33, %v6124_v13  ;;  %v4382_v51 = vadd.s32 4294967224, %v5297_v63  ;;  %v4365_v52 = vrot.slane %v6068_v32, %v6127_v15 }
 0x280   :  { %v4332_v19 = vsel %vm4331_vm0, %v4330_v12, %v4325_v49  ;;  %v4378_v53 = vsub.s32 %v4375_v16, %v5571_v47  ;;  %v4389_v55 = vadd.s32 4294967216, %v5297_v63  ;;  %v4372_v5 = vrot.slane %v6074_v35, %v6135_v50 }
 0x281   :  { %4320 = vperm.xlu1 %4807, %v4225_v8   ;;  %v4339_v21 = vsel %vm4338_vm1, %v4337_v14, %v4332_v19  ;;  %v4385_v27 = vsub.s32 %v4382_v51, %v5571_v47  ;;  %v4396_v28 = vadd.s32 4294967208, %v5297_v63  ;;  %v4410_v48 = vadd.s32 4294967192, %v5297_v63 }
 0x282   :  { %v4346_v22 = vsel %vm4345_vm2, %v4344_v17, %v4339_v21  ;;  %v4392_v35 = vsub.s32 %v4389_v55, %v5571_v47  ;;  %v4417_v0 = vadd.s32 4294967184, %v5297_v63 }
 0x283   :  { %v6072_v34 = vpop.permute.xlu0 %4251  ;;  %v4353_v24 = vsel %vm4352_vm3, %v4351_v2, %v4346_v22  ;;  %v4413_v12 = vsub.s32 %v4410_v48, %v5571_v47 }
 0x284   :  { %v4360_v8 = vsel %vm4359_vm4, %v4358_v20, %v4353_v24  ;;  %v4379_v31 = vrot.slane %v6072_v34, %v4378_v53  ;;  %v4420_v49 = vsub.s32 %v4417_v0, %v5571_v47 }
 0x285   :  { %v4367_v30 = vsel %vm4366_vm5, %v4365_v52, %v4360_v8 }
 0x289   :  { %v6078_v37 = vpop.permute.xlu1 %4254 }
 0x28e   :  { %v6076_v36 = vpop.permute.xlu0 %4257 }
 0x293   :  { %v6082_v39 = vpop.permute.xlu0 %4260 }
 0x298   :  { %v6086_v41 = vpop.permute.xlu0 %4263 }
 0x29e   :  { %v6092_v44 = vpop.permute.xlu0 %4266 }
 0x29f   :  { %v4414_v51 = vrot.slane %v6092_v44, %v4413_v12 }
 0x2a3   :  { %v6080_v38 = vpop.permute.xlu1 %4275 }
 0x2a4   :  { %v4434_v32 = vrot.slane %v6080_v38, %v4324_v4  ;;  %v4424_v4 = vadd.s32 4294967176, %v5297_v63 }
 0x2a6   :  { %v4427_v2 = vsub.s32 %v4424_v4, %v5571_v47 }
 0x2a8   :  { %v6096_v26 = vpop.permute.xlu0 %4278 }
 0x2a9   :  { %v4438_v25 = vrot.slane %v6096_v26, %v4329_v62  ;;  %v4403_v26 = vadd.s32 4294967200, %v5297_v63 }
 0x2ab   :  { %v4439_v34 = vsel %vm4331_vm0, %v4438_v25, %v4434_v32 }
 0x2ad   :  { %v6084_v40 = vpop.permute.xlu1 %4281 }
 0x2ae   :  { %v4443_v29 = vrot.slane %v6084_v40, %v4336_v1  ;;  %v4374_v40 = vsel %vm4373_vm6, %v4372_v5, %v4367_v30 }
 0x2b0   :  { %v4444_v61 = vsel %vm4338_vm1, %v4443_v29, %v4439_v34 }
 0x2b3   :  { %v6103_v59 = vpop.permute.xlu0 %4284 }
 0x2b4   :  { %v4448_v33 = vrot.slane %v6103_v59, %v6113_v6  ;;  %v4399_v59 = vsub.s32 %v4396_v28, %v5571_v47  ;;  %v4381_v6 = vsel %vm4380_vm7, %v4379_v31, %v4374_v40 }
 0x2b6   :  { %v4449_v1 = vsel %vm4345_vm2, %v4448_v33, %v4444_v61 }
 0x2b8   :  { %v6088_v42 = vpop.permute.xlu1 %4287 }
 0x2b9   :  { %v4453_v46 = vrot.slane %v6088_v42, %v6118_v9 }
 0x2bb   :  { %v4454_v9 = vsel %vm4352_vm3, %v4453_v46, %v4449_v1 }
 0x2bd   :  { %v6115_v7 = vpop.permute.xlu0 %4290 }
 0x2be   :  { %v4458_v38 = vrot.slane %v6115_v7, %v6124_v13  ;;  %v4406_v7 = vsub.s32 %v4403_v26, %v5571_v47 }
 0x2c0   :  { %v4459_v13 = vsel %vm4359_vm4, %v4458_v38, %v4454_v9 }
 0x2c2   :  { %v6090_v43 = vpop.permute.xlu1 %4293 }
 0x2c3   :  { %v4463_v62 = vrot.slane %v6090_v43, %v6127_v15  ;;  %v4386_v43 = vrot.slane %v6078_v37, %v4385_v27  ;;  %v4393_v15 = vrot.slane %v6076_v36, %v4392_v35 }
 0x2c5   :  { %v4464_v16 = vsel %vm4366_vm5, %v4463_v62, %v4459_v13 }
 0x2c8   :  { %v6131_v18 = vpop.permute.xlu0 %4296 }
 0x2c9   :  { %v4468_v3 = vrot.slane %v6131_v18, %v6135_v50  ;;  %v4400_v18 = vrot.slane %v6082_v39, %v4399_v59  ;;  %v4407_v50 = vrot.slane %v6086_v41, %v4406_v7 }
 0x2cd   :  { %v6094_v45 = vpop.permute.xlu1 %4299 }
 0x2ce   :  { %v4473_v10 = vrot.slane %v6094_v45, %v4378_v53  ;;  %v4469_v45 = vsel %vm4373_vm6, %v4468_v3, %v4464_v16 }
 0x2d0   :  { %v4474_v36 = vsel %vm4380_vm7, %v4473_v10, %v4469_v45 }
 0x2d2   :  { %v4303_v23 = vpop.permute.xlu0 %4302 }
 0x2d3   :  { %v4478_v14 = vrot.slane %v4303_v23, %v4385_v27 }
 0x2d5   :  { %v4479_v39 = vsel %vm4387_vm8, %v4478_v14, %v4474_v36 }
 0x2d7   :  { %v6100_v56 = vpop.permute.xlu1 %4305 }
 0x2d8   :  { %v4483_v63 = vrot.slane %v6100_v56, %v4392_v35  ;;  %v4388_v56 = vsel %vm4387_vm8, %v4386_v43, %v4381_v6 }
 0x2d9   :  { %v4395_v52 = vsel %vm4394_vm9, %v4393_v15, %v4388_v56 }
 0x2da   :  { %v4402_v41 = vsel %vm4401_vm10, %v4400_v18, %v4395_v52 }
 0x2dd   :  { %v4270_v42 = vpop.permute.xlu0 %4269 }
 0x2de   :  { %v4421_v47 = vrot.slane %v4270_v42, %v4420_v49 }
 0x2e2   :  { %v6121_v11 = vpop.permute.xlu1 %4308 }
 0x2e3   :  { %v4488_v37 = vrot.slane %v6121_v11, %v4399_v59  ;;  %v4484_v11 = vsel %vm4394_vm9, %v4483_v63, %v4479_v39 }
 0x2e5   :  { %v4489_v22 = vsel %vm4401_vm10, %v4488_v37, %v4484_v11 }
 0x2e7   :  { %v4273_v19 = vpop.permute.xlu0 %4272 }
 0x2e8   :  { %v4428_v55 = vrot.slane %v4273_v19, %v4427_v2 }
 0x2ec   :  { %v6145_v54 = vpop.permute.xlu1 %4311 }
 0x2ed   :  { %v4493_v20 = vrot.slane %v6145_v54, %v4406_v7  ;;  %v4409_v54 = vsel %vm4408_vm11, %v4407_v50, %v4402_v41 }
 0x2ee   :  { %v4416_v24 = vsel %vm4415_vm12, %v4414_v51, %v4409_v54 }
 0x2ef   :  { %v4494_v44 = vsel %vm4408_vm11, %v4493_v20, %v4489_v22  ;;  %v4423_v8 = vsel %vm4422_vm13, %v4421_v47, %v4416_v24 }
 0x2f0   :  { %v4430_v28 = vsel %vm4429_vm14, %v4428_v55, %v4423_v8 }
 0x2f2   :  { %v4315_v58 = vpop.permute.xlu1 %4314 }
 0x2f3   :  { %v4498_v21 = vrot.slane %v4315_v58, %v4413_v12 }
 0x2f5   :  { %v4499_v5 = vsel %vm4415_vm12, %v4498_v21, %v4494_v44 }
 0x2f7   :  { %v4318_v17 = vpop.permute.xlu1 %4317 }
 0x2f8   :  { %v4503_v53 = vrot.slane %v4318_v17, %v4420_v49 }
 0x2fa   :  { %v4504_v27 = vsel %vm4422_vm13, %v4503_v53, %v4499_v5 }
 0x2fc   :  { %v4321_v23 = vpop.permute.xlu1 %4320 }
 0x2fd   :  { %v4508_v25 = vrot.slane %v4321_v23, %v4427_v2 }
 0x2ff   :  { %v4509_v29 = vsel %vm4429_vm14, %v4508_v25, %v4504_v27 }
 0x300   :  { %v4510_v30 = vcombine.low %v4430_v28, %v4509_v29 }
 0x302   :  { %v4517_v31 = vrot.slane %v4510_v30, %v5598_v57 }
 0x304   :  { %v4524_v32 = vrot.slane %v4517_v31, %v5598_v57 }
 0x306   :  { %4530 = vst.msk [vmem:[#allocation4] sm:$0x3] %vm4528_vm15, %v4524_v32 }
 0x307   :  { %4819 = shalt.err (!%p4816_p4)
}
 0x308   :  { %4540 = dma.vmem_to_hbm [thread:$0]  %s4538_s1, 32, %s6219_s4, [#allocation5]  }
 0x309   :  { %4828 = dma.done.wait [#allocation5], 32  }
 0x30a   :  { %4829 = vsyncadd [#allocation5], 4294967264 }
 0x30b   :  { %4544 = vsyncpa [#allocation5], 1 }

</bundles_post_ra>
